<compile_context>
chip_gen: v6e
topology: v6e:2x2x1
jax: 0.10.0
libtpu: 0.0.40
codegen_flags: <defaults>
</compile_context>

<pallas_src>
import functools

import jax
import jax.numpy as jnp
from jax.experimental import pallas as pl
from jax.experimental.pallas import tpu as pltpu

# Large finite negative instead of -inf so fully-masked rows give a uniform
# distribution rather than NaN (the PyTorch module asserts no NaN).
_NEG_INF = -1e9


def _layer_norm(v, w, b, eps=1e-5):
    """PyTorch-style LayerNorm over the last axis (biased variance)."""
    mu = jnp.mean(v, axis=-1, keepdims=True)
    var = jnp.mean((v - mu) ** 2, axis=-1, keepdims=True)
    return (v - mu) * jax.lax.rsqrt(var + eps) * w + b


def _encoder_block_kernel(num_heads, batched_heads,
                          x_ref, kpm_ref, causal_ref,
                          ln1_w_ref, ln1_b_ref,
                          wq_ref, bq_ref, wk_ref, bk_ref, wv_ref, bv_ref,
                          wo_ref, bo_ref,
                          ln2_w_ref, ln2_b_ref,
                          wf1_ref, bf1_ref, wf2_ref, bf2_ref,
                          o_ref):
    """One grid step == one block of batch elements, whole block fused in VMEM."""
    Bb, S, D = x_ref.shape
    H = num_heads
    dh = D // H

    x = x_ref[...].astype(jnp.float32)                      # (Bb, S, D)
    x2 = x.reshape(Bb * S, D)                               # rows for all matmuls

    # ---- h = LayerNorm1(x); QKV projections (scale already folded into Wq) ----
    h = _layer_norm(x2, ln1_w_ref[...], ln1_b_ref[...])
    h16 = h.astype(jnp.bfloat16)

    def proj(w_ref, b_ref):
        return jnp.dot(h16, w_ref[...], preferred_element_type=jnp.float32) + b_ref[...]

    q = proj(wq_ref, bq_ref)                                # (Bb*S, D), pre-scaled
    k = proj(wk_ref, bk_ref)
    v = proj(wv_ref, bv_ref)

    causal = causal_ref[...]                                # (S, S) additive bias
    kpm = kpm_ref[...]                                      # (Bb, 1, S) additive bias

    if batched_heads:
        # Keep (Bb, S, H, dh) layout; no swapaxes relayouts, and the per-head
        # bias is formed only by broadcasting inside the score add.
        q4 = q.reshape(Bb, S, H, dh).astype(jnp.bfloat16)
        k4 = k.reshape(Bb, S, H, dh).astype(jnp.bfloat16)
        v4 = v.reshape(Bb, S, H, dh).astype(jnp.bfloat16)
        s = jnp.einsum('bqhd,bkhd->bhqk', q4, k4,
                       preferred_element_type=jnp.float32)  # (Bb, H, S, S)
        s = s + causal[None, None] + kpm[:, None]
        s = s - jnp.max(s, axis=-1, keepdims=True)
        p = jnp.exp(s)
        p = p * pl.reciprocal(jnp.sum(p, axis=-1, keepdims=True), approx=True)
        attn = jnp.einsum('bhqk,bkhd->bqhd', p.astype(jnp.bfloat16), v4,
                          preferred_element_type=jnp.float32)
        attn = attn.reshape(Bb * S, D)
    else:
        # Conservative fallback: head-major layout + single-leading-batch einsums.
        def heads(t):
            t = jnp.swapaxes(t.reshape(Bb, S, H, dh), 1, 2)  # (Bb, H, S, dh)
            return t.reshape(Bb * H, S, dh).astype(jnp.bfloat16)
        qh, kh, vh = heads(q), heads(k), heads(v)
        s = jnp.einsum('nqd,nkd->nqk', qh, kh,
                       preferred_element_type=jnp.float32)   # (Bb*H, S, S)
        s = s.reshape(Bb, H, S, S) + causal[None, None] + kpm[:, None]
        s = s - jnp.max(s, axis=-1, keepdims=True)
        p = jnp.exp(s)
        p = p * pl.reciprocal(jnp.sum(p, axis=-1, keepdims=True), approx=True)
        attn = jnp.einsum('nqk,nkd->nqd',
                          p.reshape(Bb * H, S, S).astype(jnp.bfloat16), vh,
                          preferred_element_type=jnp.float32)
        attn = jnp.swapaxes(attn.reshape(Bb, H, S, dh), 1, 2).reshape(Bb * S, D)

    mha = jnp.dot(attn.astype(jnp.bfloat16), wo_ref[...],
                  preferred_element_type=jnp.float32) + bo_ref[...]
    h2 = x2 + mha                                            # residual 1

    # ---- out = h2 + FeedForward(LayerNorm2(h2)) ----
    # TODO(synk): PointwiseFeedForward source not provided; assumed
    # Linear(D,4D) -> GELU -> Dropout -> Linear(4D,D) -> Dropout with dropout =
    # identity (eval mode). tanh-GELU used (PyTorch nn.GELU defaults to exact erf).
    g = _layer_norm(h2, ln2_w_ref[...], ln2_b_ref[...])
    f = jnp.dot(g.astype(jnp.bfloat16), wf1_ref[...],
                preferred_element_type=jnp.float32) + bf1_ref[...]
    f = jax.nn.gelu(f, approximate=True)
    f = jnp.dot(f.astype(jnp.bfloat16), wf2_ref[...],
                preferred_element_type=jnp.float32) + bf2_ref[...]

    o_ref[...] = (h2 + f).reshape(Bb, S, D).astype(o_ref.dtype)   # residual 2


def _vmem_limit_bytes():
    """~3/4 of this chip's physical VMEM (96 MiB on v5e/v6e, 48 MiB on v7x)."""
    try:
        cap = int(pltpu.get_tpu_info().vmem_capacity_bytes)
    except Exception:
        cap = 64 * 1024 * 1024
    return max(32 * 1024 * 1024, min(cap * 3 // 4, 112 * 1024 * 1024))


def _pick_batch_block(batch, seq, hidden, num_heads, ff_hidden, vmem_limit):
    # rough f32 footprint per batch element of one fused step (scores +
    # activations + FFN intermediate); keep ~2x headroom inside the VMEM limit.
    per_elem = 4 * seq * (num_heads * seq + 8 * hidden + ff_hidden)
    bb = max(1, int((vmem_limit // 2) // max(per_elem, 1)))
    # keep >= 2 grid steps so both v7x TensorCores get work ("parallel" axis);
    # the ~0.35us extra step is negligible on single-TC v5e/v6e.
    bb = min(bb, batch, 32, max(1, batch // 2))
    while batch % bb:
        bb -= 1
    return bb


def transformer_encoder_block(x, attn_mask, key_padding_mask, params, num_heads,
                              batch_block=None):
    """x: (B,S,D) f32; attn_mask: (B,S,S) bool (True = blocked), assumed causal /
    batch-invariant (module calls MHA with is_causal=True); key_padding_mask:
    (B,S) bool (True = padded key)."""
    B, S, D = x.shape
    H = num_heads
    dh = D // H

    # Tiny additive biases; the full (B,H,S,S) bias is never materialized in
    # HBM or VMEM — it is formed by broadcasting inside the score addition.
    if attn_mask is not None:
        # TODO(synk): batch-varying (non-causal) attn_mask is not supported;
        # batch slice 0 is used for all batch elements (is_causal semantics).
        causal_bias = jnp.where(attn_mask[0], _NEG_INF, 0.0).astype(jnp.float32)
    else:
        causal_bias = jnp.where(jnp.triu(jnp.ones((S, S), jnp.bool_), k=1),
                                _NEG_INF, 0.0).astype(jnp.float32)
    pad_bias = jnp.where(key_padding_mask, _NEG_INF, 0.0).astype(jnp.float32)[:, None, :]

    vmem_limit = _vmem_limit_bytes()
    ff_hidden = params['w_ff1'].shape[1]
    if batch_block is None:
        batch_block = _pick_batch_block(B, S, D, H, ff_hidden, vmem_limit)

    # Split the packed in_proj into Q/K/V outside the kernel, fold the softmax
    # scale into Wq/bq, and cast all matmul weights to bf16 (accumulation stays
    # f32 inside the kernel; biases / LN params stay f32).
    scale = 1.0 / (dh ** 0.5)
    w_in, b_in = params['w_in'], params['b_in']
    bf16 = lambda a: a.astype(jnp.bfloat16)
    weight_args = (
        params['ln1_w'], params['ln1_b'],
        bf16(w_in[:, :D] * scale), b_in[:, :D] * scale,
        bf16(w_in[:, D:2 * D]), b_in[:, D:2 * D],
        bf16(w_in[:, 2 * D:]), b_in[:, 2 * D:],
        bf16(params['w_out']), params['b_out'],
        params['ln2_w'], params['ln2_b'],
        bf16(params['w_ff1']), params['b_ff1'],
        bf16(params['w_ff2']), params['b_ff2'],
    )

    # Advisory cost estimate so XLA can overlap this call with neighbors.
    flops = 2 * B * S * D * (4 * D + 2 * ff_hidden) + 4 * B * S * S * D
    transcendentals = B * H * S * S + B * S * ff_hidden
    bytes_accessed = (2 * B * S * D * 4 + B * S * 4 + S * S * 4
                      + sum(int(a.size) * a.dtype.itemsize for a in weight_args))
    cost = pl.CostEstimate(flops=int(flops), transcendentals=int(transcendentals),
                           bytes_accessed=int(bytes_accessed))

    def build(batched_heads, single_buffer_weights):
        def const_spec(a):
            idx = lambda b, _nd=a.ndim: (0,) * _nd
            if single_buffer_weights:
                # index_map never changes -> no need to double-buffer weights.
                return pl.BlockSpec(a.shape, idx, pipeline_mode=pl.Buffered(1))
            return pl.BlockSpec(a.shape, idx)

        kernel = functools.partial(_encoder_block_kernel, num_heads, batched_heads)
        return pl.pallas_call(
            kernel,
            out_shape=jax.ShapeDtypeStruct((B, S, D), x.dtype),
            grid=(B // batch_block,),
            in_specs=[pl.BlockSpec((batch_block, S, D), lambda b: (b, 0, 0)),   # x
                      pl.BlockSpec((batch_block, 1, S), lambda b: (b, 0, 0)),   # pad bias
                      pl.BlockSpec((S, S), lambda b: (0, 0))]                   # causal bias
                     + [const_spec(a) for a in weight_args],
            out_specs=pl.BlockSpec((batch_block, S, D), lambda b: (b, 0, 0)),
            compiler_params=pltpu.CompilerParams(
                dimension_semantics=("parallel",),
                vmem_limit_bytes=vmem_limit),
            cost_estimate=cost,
        )

    args = (x, pad_bias, causal_bias) + weight_args
    try:
        return build(batched_heads=True, single_buffer_weights=True)(*args)
    except Exception:
        # Fallback for TPU stacks where the batched 4-D dot_general or
        # single-buffered pipeline_mode do not lower: head-major relayout path
        # with default (double-buffered) weight specs.
        return build(batched_heads=False, single_buffer_weights=False)(*args)


def init_params(key, hidden, ff_hidden):
    ks = jax.random.split(key, 8)
    init = lambda k, shape: 0.02 * jax.random.normal(k, shape, jnp.float32)
    return dict(
        ln1_w=jnp.ones((1, hidden), jnp.float32),
        ln1_b=jnp.zeros((1, hidden), jnp.float32),
        ln2_w=jnp.ones((1, hidden), jnp.float32),
        ln2_b=jnp.zeros((1, hidden), jnp.float32),
        # nn.MultiheadAttention in_proj (pre-transposed): (D, 3D) + (1, 3D)
        w_in=init(ks[0], (hidden, 3 * hidden)),
        b_in=init(ks[1], (1, 3 * hidden)),
        # out_proj: (D, D) + (1, D)
        w_out=init(ks[2], (hidden, hidden)),
        b_out=init(ks[3], (1, hidden)),
        # PointwiseFeedForward: Linear(D, 4D), Linear(4D, D)
        w_ff1=init(ks[4], (hidden, ff_hidden)),
        b_ff1=init(ks[5], (1, ff_hidden)),
        w_ff2=init(ks[6], (ff_hidden, hidden)),
        b_ff2=init(ks[7], (1, hidden)),
    )


if __name__ == "__main__":
    B, S, D, H = 2, 8, 32, 4  # batch, seq_len, hidden_size, num_attention_heads

    key = jax.random.PRNGKey(0)
    kx, kp = jax.random.split(key, 2)

    x = jax.random.normal(kx, (B, S, D), jnp.float32)
    causal = jnp.triu(jnp.ones((S, S), dtype=jnp.bool_), k=1)        # True = blocked
    attn_mask = jnp.broadcast_to(causal, (B, S, S))
    key_padding_mask = jnp.zeros((B, S), dtype=jnp.bool_).at[1, S - 2:].set(True)

    params = init_params(kp, D, 4 * D)

    out = transformer_encoder_block(x, attn_mask, key_padding_mask, params, H)
    jax.block_until_ready(out)
    assert out.shape == (B, S, D)
    assert not bool(jnp.isnan(out).any())
    print("KERNEL_OK")
</pallas_src>

<mosaic_0001>
module attributes {stable_mosaic.version = 11 : i64} {
  func.func @_encoder_block_kernel(%arg0: i32, %arg1: memref<1x8x32xf32, #tpu.memory_space<vmem>>, %arg2: memref<1x1x8xf32, #tpu.memory_space<vmem>>, %arg3: memref<8x8xf32, #tpu.memory_space<vmem>>, %arg4: memref<1x32xf32, #tpu.memory_space<vmem>>, %arg5: memref<1x32xf32, #tpu.memory_space<vmem>>, %arg6: memref<32x32xbf16, #tpu.memory_space<vmem>>, %arg7: memref<1x32xf32, #tpu.memory_space<vmem>>, %arg8: memref<32x32xbf16, #tpu.memory_space<vmem>>, %arg9: memref<1x32xf32, #tpu.memory_space<vmem>>, %arg10: memref<32x32xbf16, #tpu.memory_space<vmem>>, %arg11: memref<1x32xf32, #tpu.memory_space<vmem>>, %arg12: memref<32x32xbf16, #tpu.memory_space<vmem>>, %arg13: memref<1x32xf32, #tpu.memory_space<vmem>>, %arg14: memref<1x32xf32, #tpu.memory_space<vmem>>, %arg15: memref<1x32xf32, #tpu.memory_space<vmem>>, %arg16: memref<32x128xbf16, #tpu.memory_space<vmem>>, %arg17: memref<1x128xf32, #tpu.memory_space<vmem>>, %arg18: memref<128x32xbf16, #tpu.memory_space<vmem>>, %arg19: memref<1x32xf32, #tpu.memory_space<vmem>>, %arg20: memref<1x8x32xf32, #tpu.memory_space<vmem>>) attributes {dimension_semantics = [#tpu.dimension_semantics<parallel>], iteration_bounds = array<i64: 2>, scalar_prefetch = 0 : i64, scratch_operands = 0 : i64, tpu.core_type = #tpu.core_type<tc>, window_params = [{transform_indices = @transform_0, window_bounds = array<i64: 1, 8, 32>}, {transform_indices = @transform_1, window_bounds = array<i64: 1, 1, 8>}, {pipeline_mode = #tpu.pipeline_mode<synchronous>, transform_indices = @transform_2, window_bounds = array<i64: 8, 8>}, {pipeline_mode = #tpu.pipeline_mode<synchronous>, transform_indices = @transform_3, window_bounds = array<i64: 1, 32>}, {pipeline_mode = #tpu.pipeline_mode<synchronous>, transform_indices = @transform_4, window_bounds = array<i64: 1, 32>}, {pipeline_mode = #tpu.pipeline_mode<synchronous>, transform_indices = @transform_5, window_bounds = array<i64: 32, 32>}, {pipeline_mode = #tpu.pipeline_mode<synchronous>, transform_indices = @transform_6, window_bounds = array<i64: 1, 32>}, {pipeline_mode = #tpu.pipeline_mode<synchronous>, transform_indices = @transform_7, window_bounds = array<i64: 32, 32>}, {pipeline_mode = #tpu.pipeline_mode<synchronous>, transform_indices = @transform_8, window_bounds = array<i64: 1, 32>}, {pipeline_mode = #tpu.pipeline_mode<synchronous>, transform_indices = @transform_9, window_bounds = array<i64: 32, 32>}, {pipeline_mode = #tpu.pipeline_mode<synchronous>, transform_indices = @transform_10, window_bounds = array<i64: 1, 32>}, {pipeline_mode = #tpu.pipeline_mode<synchronous>, transform_indices = @transform_11, window_bounds = array<i64: 32, 32>}, {pipeline_mode = #tpu.pipeline_mode<synchronous>, transform_indices = @transform_12, window_bounds = array<i64: 1, 32>}, {pipeline_mode = #tpu.pipeline_mode<synchronous>, transform_indices = @transform_13, window_bounds = array<i64: 1, 32>}, {pipeline_mode = #tpu.pipeline_mode<synchronous>, transform_indices = @transform_14, window_bounds = array<i64: 1, 32>}, {pipeline_mode = #tpu.pipeline_mode<synchronous>, transform_indices = @transform_15, window_bounds = array<i64: 32, 128>}, {pipeline_mode = #tpu.pipeline_mode<synchronous>, transform_indices = @transform_16, window_bounds = array<i64: 1, 128>}, {pipeline_mode = #tpu.pipeline_mode<synchronous>, transform_indices = @transform_17, window_bounds = array<i64: 128, 32>}, {pipeline_mode = #tpu.pipeline_mode<synchronous>, transform_indices = @transform_18, window_bounds = array<i64: 1, 32>}, {transform_indices = @transform_19, window_bounds = array<i64: 1, 8, 32>}]} {
    %c0 = arith.constant 0 : index
    %c0_0 = arith.constant 0 : index
    %c0_1 = arith.constant 0 : index
    %0 = vector.load %arg1[%c0, %c0_0, %c0_1] : memref<1x8x32xf32, #tpu.memory_space<vmem>>, vector<1x8x32xf32>
    %1 = vector.shape_cast %0 : vector<1x8x32xf32> to vector<8x32xf32>
    %c0_2 = arith.constant 0 : index
    %c0_3 = arith.constant 0 : index
    %2 = vector.load %arg4[%c0_2, %c0_3] : memref<1x32xf32, #tpu.memory_space<vmem>>, vector<1x32xf32>
    %c0_4 = arith.constant 0 : index
    %c0_5 = arith.constant 0 : index
    %3 = vector.load %arg5[%c0_4, %c0_5] : memref<1x32xf32, #tpu.memory_space<vmem>>, vector<1x32xf32>
    %cst = arith.constant dense<0.000000e+00> : vector<8xf32>
    %4 = vector.multi_reduction <add>, %1, %cst [1] : vector<8x32xf32> to vector<8xf32>
    %5 = vector.shape_cast %4 : vector<8xf32> to vector<8x1xf32>
    %cst_6 = arith.constant 3.200000e+01 : f32
    %6 = vector.broadcast %cst_6 : f32 to vector<8x1xf32>
    %7 = arith.divf %5, %6 : vector<8x1xf32>
    %8 = vector.broadcast %7 : vector<8x1xf32> to vector<8x32xf32>
    %9 = arith.subf %1, %8 : vector<8x32xf32>
    %10 = arith.mulf %9, %9 : vector<8x32xf32>
    %cst_7 = arith.constant dense<0.000000e+00> : vector<8xf32>
    %11 = vector.multi_reduction <add>, %10, %cst_7 [1] : vector<8x32xf32> to vector<8xf32>
    %12 = vector.shape_cast %11 : vector<8xf32> to vector<8x1xf32>
    %cst_8 = arith.constant 3.200000e+01 : f32
    %13 = vector.broadcast %cst_8 : f32 to vector<8x1xf32>
    %14 = arith.divf %12, %13 : vector<8x1xf32>
    %15 = vector.broadcast %7 : vector<8x1xf32> to vector<8x32xf32>
    %16 = arith.subf %1, %15 : vector<8x32xf32>
    %cst_9 = arith.constant 9.99999974E-6 : f32
    %17 = vector.broadcast %cst_9 : f32 to vector<8x1xf32>
    %18 = arith.addf %14, %17 : vector<8x1xf32>
    %19 = math.rsqrt %18 : vector<8x1xf32>
    %20 = vector.broadcast %19 : vector<8x1xf32> to vector<8x32xf32>
    %21 = arith.mulf %16, %20 : vector<8x32xf32>
    %22 = vector.broadcast %2 : vector<1x32xf32> to vector<8x32xf32>
    %23 = arith.mulf %21, %22 : vector<8x32xf32>
    %24 = vector.broadcast %3 : vector<1x32xf32> to vector<8x32xf32>
    %25 = arith.addf %23, %24 : vector<8x32xf32>
    %26 = arith.truncf %25 : vector<8x32xf32> to vector<8x32xbf16>
    %c0_10 = arith.constant 0 : index
    %c0_11 = arith.constant 0 : index
    %27 = vector.load %arg6[%c0_10, %c0_11] : memref<32x32xbf16, #tpu.memory_space<vmem>>, vector<32x32xbf16>
    %cst_12 = arith.constant dense<0.000000e+00> : vector<8x32xf32>
    %28 = tpu.matmul %26, %27, %cst_12 {dimension_numbers = #tpu.dot_dimension_numbers<[1], [0], [0], [1], [0, 0, 1, 1], [], []>} : vector<8x32xbf16>, vector<32x32xbf16>, vector<8x32xf32> -> vector<8x32xf32>
    %c0_13 = arith.constant 0 : index
    %c0_14 = arith.constant 0 : index
    %29 = vector.load %arg7[%c0_13, %c0_14] : memref<1x32xf32, #tpu.memory_space<vmem>>, vector<1x32xf32>
    %30 = vector.broadcast %29 : vector<1x32xf32> to vector<8x32xf32>
    %31 = arith.addf %28, %30 : vector<8x32xf32>
    %c0_15 = arith.constant 0 : index
    %c0_16 = arith.constant 0 : index
    %32 = vector.load %arg8[%c0_15, %c0_16] : memref<32x32xbf16, #tpu.memory_space<vmem>>, vector<32x32xbf16>
    %cst_17 = arith.constant dense<0.000000e+00> : vector<8x32xf32>
    %33 = tpu.matmul %26, %32, %cst_17 {dimension_numbers = #tpu.dot_dimension_numbers<[1], [0], [0], [1], [0, 0, 1, 1], [], []>} : vector<8x32xbf16>, vector<32x32xbf16>, vector<8x32xf32> -> vector<8x32xf32>
    %c0_18 = arith.constant 0 : index
    %c0_19 = arith.constant 0 : index
    %34 = vector.load %arg9[%c0_18, %c0_19] : memref<1x32xf32, #tpu.memory_space<vmem>>, vector<1x32xf32>
    %35 = vector.broadcast %34 : vector<1x32xf32> to vector<8x32xf32>
    %36 = arith.addf %33, %35 : vector<8x32xf32>
    %c0_20 = arith.constant 0 : index
    %c0_21 = arith.constant 0 : index
    %37 = vector.load %arg10[%c0_20, %c0_21] : memref<32x32xbf16, #tpu.memory_space<vmem>>, vector<32x32xbf16>
    %cst_22 = arith.constant dense<0.000000e+00> : vector<8x32xf32>
    %38 = tpu.matmul %26, %37, %cst_22 {dimension_numbers = #tpu.dot_dimension_numbers<[1], [0], [0], [1], [0, 0, 1, 1], [], []>} : vector<8x32xbf16>, vector<32x32xbf16>, vector<8x32xf32> -> vector<8x32xf32>
    %c0_23 = arith.constant 0 : index
    %c0_24 = arith.constant 0 : index
    %39 = vector.load %arg11[%c0_23, %c0_24] : memref<1x32xf32, #tpu.memory_space<vmem>>, vector<1x32xf32>
    %40 = vector.broadcast %39 : vector<1x32xf32> to vector<8x32xf32>
    %41 = arith.addf %38, %40 : vector<8x32xf32>
    %c0_25 = arith.constant 0 : index
    %c0_26 = arith.constant 0 : index
    %42 = vector.load %arg3[%c0_25, %c0_26] : memref<8x8xf32, #tpu.memory_space<vmem>>, vector<8x8xf32>
    %c0_27 = arith.constant 0 : index
    %c0_28 = arith.constant 0 : index
    %c0_29 = arith.constant 0 : index
    %43 = vector.load %arg2[%c0_27, %c0_28, %c0_29] : memref<1x1x8xf32, #tpu.memory_space<vmem>>, vector<1x1x8xf32>
    %44 = vector.shape_cast %31 : vector<8x32xf32> to vector<1x8x4x8xf32>
    %45 = tpu.transpose %44, [0, 2, 1, 3] : vector<1x8x4x8xf32> -> vector<1x4x8x8xf32>
    %46 = vector.shape_cast %45 : vector<1x4x8x8xf32> to vector<4x8x8xf32>
    %47 = arith.truncf %46 : vector<4x8x8xf32> to vector<4x8x8xbf16>
    %48 = vector.shape_cast %36 : vector<8x32xf32> to vector<1x8x4x8xf32>
    %49 = tpu.transpose %48, [0, 2, 1, 3] : vector<1x8x4x8xf32> -> vector<1x4x8x8xf32>
    %50 = vector.shape_cast %49 : vector<1x4x8x8xf32> to vector<4x8x8xf32>
    %51 = arith.truncf %50 : vector<4x8x8xf32> to vector<4x8x8xbf16>
    %52 = vector.shape_cast %41 : vector<8x32xf32> to vector<1x8x4x8xf32>
    %53 = tpu.transpose %52, [0, 2, 1, 3] : vector<1x8x4x8xf32> -> vector<1x4x8x8xf32>
    %54 = vector.shape_cast %53 : vector<1x4x8x8xf32> to vector<4x8x8xf32>
    %55 = arith.truncf %54 : vector<4x8x8xf32> to vector<4x8x8xbf16>
    "tpu.trace_start"() <{level = 10 : i32, message = "nqd,nkd->nqk"}> : () -> ()
    %cst_30 = arith.constant dense<0.000000e+00> : vector<4x8x8xf32>
    %56 = tpu.matmul %47, %51, %cst_30 {dimension_numbers = #tpu.dot_dimension_numbers<[2], [2], [1], [1], [0, 0, 0, 1, 1, 1], [0], [0]>} : vector<4x8x8xbf16>, vector<4x8x8xbf16>, vector<4x8x8xf32> -> vector<4x8x8xf32>
    "tpu.trace_stop"() : () -> ()
    %57 = vector.shape_cast %56 : vector<4x8x8xf32> to vector<1x4x8x8xf32>
    %58 = vector.shape_cast %42 : vector<8x8xf32> to vector<1x1x8x8xf32>
    %59 = vector.broadcast %58 : vector<1x1x8x8xf32> to vector<1x4x8x8xf32>
    %60 = arith.addf %57, %59 : vector<1x4x8x8xf32>
    %61 = vector.shape_cast %43 : vector<1x1x8xf32> to vector<1x1x1x8xf32>
    %62 = vector.broadcast %61 : vector<1x1x1x8xf32> to vector<1x4x8x8xf32>
    %63 = arith.addf %60, %62 : vector<1x4x8x8xf32>
    %cst_31 = arith.constant dense<0xFF800000> : vector<1x4x8xf32>
    %64 = vector.multi_reduction <maximumf>, %63, %cst_31 [3] : vector<1x4x8x8xf32> to vector<1x4x8xf32>
    %65 = vector.shape_cast %64 : vector<1x4x8xf32> to vector<1x4x8x1xf32>
    %66 = vector.broadcast %65 : vector<1x4x8x1xf32> to vector<1x4x8x8xf32>
    %67 = arith.subf %63, %66 : vector<1x4x8x8xf32>
    %68 = math.exp %67 : vector<1x4x8x8xf32>
    %cst_32 = arith.constant dense<0.000000e+00> : vector<1x4x8xf32>
    %69 = vector.multi_reduction <add>, %68, %cst_32 [3] : vector<1x4x8x8xf32> to vector<1x4x8xf32>
    %70 = vector.shape_cast %69 : vector<1x4x8xf32> to vector<1x4x8x1xf32>
    %71 = tpu.reciprocal %70 {approx = true} : vector<1x4x8x1xf32> -> vector<1x4x8x1xf32>
    %72 = vector.broadcast %71 : vector<1x4x8x1xf32> to vector<1x4x8x8xf32>
    %73 = arith.mulf %68, %72 : vector<1x4x8x8xf32>
    %74 = vector.shape_cast %73 : vector<1x4x8x8xf32> to vector<4x8x8xf32>
    %75 = arith.truncf %74 : vector<4x8x8xf32> to vector<4x8x8xbf16>
    "tpu.trace_start"() <{level = 10 : i32, message = "nqk,nkd->nqd"}> : () -> ()
    %cst_33 = arith.constant dense<0.000000e+00> : vector<4x8x8xf32>
    %76 = tpu.matmul %75, %55, %cst_33 {dimension_numbers = #tpu.dot_dimension_numbers<[2], [1], [1], [2], [0, 0, 0, 1, 1, 2], [0], [0]>} : vector<4x8x8xbf16>, vector<4x8x8xbf16>, vector<4x8x8xf32> -> vector<4x8x8xf32>
    "tpu.trace_stop"() : () -> ()
    %77 = vector.shape_cast %76 : vector<4x8x8xf32> to vector<1x4x8x8xf32>
    %78 = tpu.transpose %77, [0, 2, 1, 3] : vector<1x4x8x8xf32> -> vector<1x8x4x8xf32>
    %79 = vector.shape_cast %78 : vector<1x8x4x8xf32> to vector<8x32xf32>
    %80 = arith.truncf %79 : vector<8x32xf32> to vector<8x32xbf16>
    %c0_34 = arith.constant 0 : index
    %c0_35 = arith.constant 0 : index
    %81 = vector.load %arg12[%c0_34, %c0_35] : memref<32x32xbf16, #tpu.memory_space<vmem>>, vector<32x32xbf16>
    %cst_36 = arith.constant dense<0.000000e+00> : vector<8x32xf32>
    %82 = tpu.matmul %80, %81, %cst_36 {dimension_numbers = #tpu.dot_dimension_numbers<[1], [0], [0], [1], [0, 0, 1, 1], [], []>} : vector<8x32xbf16>, vector<32x32xbf16>, vector<8x32xf32> -> vector<8x32xf32>
    %c0_37 = arith.constant 0 : index
    %c0_38 = arith.constant 0 : index
    %83 = vector.load %arg13[%c0_37, %c0_38] : memref<1x32xf32, #tpu.memory_space<vmem>>, vector<1x32xf32>
    %84 = vector.broadcast %83 : vector<1x32xf32> to vector<8x32xf32>
    %85 = arith.addf %82, %84 : vector<8x32xf32>
    %86 = arith.addf %1, %85 : vector<8x32xf32>
    %c0_39 = arith.constant 0 : index
    %c0_40 = arith.constant 0 : index
    %87 = vector.load %arg14[%c0_39, %c0_40] : memref<1x32xf32, #tpu.memory_space<vmem>>, vector<1x32xf32>
    %c0_41 = arith.constant 0 : index
    %c0_42 = arith.constant 0 : index
    %88 = vector.load %arg15[%c0_41, %c0_42] : memref<1x32xf32, #tpu.memory_space<vmem>>, vector<1x32xf32>
    %cst_43 = arith.constant dense<0.000000e+00> : vector<8xf32>
    %89 = vector.multi_reduction <add>, %86, %cst_43 [1] : vector<8x32xf32> to vector<8xf32>
    %90 = vector.shape_cast %89 : vector<8xf32> to vector<8x1xf32>
    %cst_44 = arith.constant 3.200000e+01 : f32
    %91 = vector.broadcast %cst_44 : f32 to vector<8x1xf32>
    %92 = arith.divf %90, %91 : vector<8x1xf32>
    %93 = vector.broadcast %92 : vector<8x1xf32> to vector<8x32xf32>
    %94 = arith.subf %86, %93 : vector<8x32xf32>
    %95 = arith.mulf %94, %94 : vector<8x32xf32>
    %cst_45 = arith.constant dense<0.000000e+00> : vector<8xf32>
    %96 = vector.multi_reduction <add>, %95, %cst_45 [1] : vector<8x32xf32> to vector<8xf32>
    %97 = vector.shape_cast %96 : vector<8xf32> to vector<8x1xf32>
    %cst_46 = arith.constant 3.200000e+01 : f32
    %98 = vector.broadcast %cst_46 : f32 to vector<8x1xf32>
    %99 = arith.divf %97, %98 : vector<8x1xf32>
    %100 = vector.broadcast %92 : vector<8x1xf32> to vector<8x32xf32>
    %101 = arith.subf %86, %100 : vector<8x32xf32>
    %cst_47 = arith.constant 9.99999974E-6 : f32
    %102 = vector.broadcast %cst_47 : f32 to vector<8x1xf32>
    %103 = arith.addf %99, %102 : vector<8x1xf32>
    %104 = math.rsqrt %103 : vector<8x1xf32>
    %105 = vector.broadcast %104 : vector<8x1xf32> to vector<8x32xf32>
    %106 = arith.mulf %101, %105 : vector<8x32xf32>
    %107 = vector.broadcast %87 : vector<1x32xf32> to vector<8x32xf32>
    %108 = arith.mulf %106, %107 : vector<8x32xf32>
    %109 = vector.broadcast %88 : vector<1x32xf32> to vector<8x32xf32>
    %110 = arith.addf %108, %109 : vector<8x32xf32>
    %111 = arith.truncf %110 : vector<8x32xf32> to vector<8x32xbf16>
    %c0_48 = arith.constant 0 : index
    %c0_49 = arith.constant 0 : index
    %112 = vector.load %arg16[%c0_48, %c0_49] : memref<32x128xbf16, #tpu.memory_space<vmem>>, vector<32x128xbf16>
    %cst_50 = arith.constant dense<0.000000e+00> : vector<8x128xf32>
    %113 = tpu.matmul %111, %112, %cst_50 {dimension_numbers = #tpu.dot_dimension_numbers<[1], [0], [0], [1], [0, 0, 1, 1], [], []>} : vector<8x32xbf16>, vector<32x128xbf16>, vector<8x128xf32> -> vector<8x128xf32>
    %c0_51 = arith.constant 0 : index
    %c0_52 = arith.constant 0 : index
    %114 = vector.load %arg17[%c0_51, %c0_52] : memref<1x128xf32, #tpu.memory_space<vmem>>, vector<1x128xf32>
    %115 = vector.broadcast %114 : vector<1x128xf32> to vector<8x128xf32>
    %116 = arith.addf %113, %115 : vector<8x128xf32>
    %117 = arith.mulf %116, %116 : vector<8x128xf32>
    %118 = arith.mulf %116, %117 : vector<8x128xf32>
    %cst_53 = arith.constant 4.471500e-02 : f32
    %119 = vector.broadcast %cst_53 : f32 to vector<8x128xf32>
    %120 = arith.mulf %119, %118 : vector<8x128xf32>
    %121 = arith.addf %116, %120 : vector<8x128xf32>
    %cst_54 = arith.constant 0.797884583 : f32
    %122 = vector.broadcast %cst_54 : f32 to vector<8x128xf32>
    %123 = arith.mulf %122, %121 : vector<8x128xf32>
    %124 = math.tanh %123 : vector<8x128xf32>
    %cst_55 = arith.constant 1.000000e+00 : f32
    %125 = vector.broadcast %cst_55 : f32 to vector<8x128xf32>
    %126 = arith.addf %125, %124 : vector<8x128xf32>
    %cst_56 = arith.constant 5.000000e-01 : f32
    %127 = vector.broadcast %cst_56 : f32 to vector<8x128xf32>
    %128 = arith.mulf %127, %126 : vector<8x128xf32>
    %129 = arith.mulf %116, %128 : vector<8x128xf32>
    %130 = arith.truncf %129 : vector<8x128xf32> to vector<8x128xbf16>
    %c0_57 = arith.constant 0 : index
    %c0_58 = arith.constant 0 : index
    %131 = vector.load %arg18[%c0_57, %c0_58] : memref<128x32xbf16, #tpu.memory_space<vmem>>, vector<128x32xbf16>
    %cst_59 = arith.constant dense<0.000000e+00> : vector<8x32xf32>
    %132 = tpu.matmul %130, %131, %cst_59 {dimension_numbers = #tpu.dot_dimension_numbers<[1], [0], [0], [1], [0, 0, 1, 1], [], []>} : vector<8x128xbf16>, vector<128x32xbf16>, vector<8x32xf32> -> vector<8x32xf32>
    %c0_60 = arith.constant 0 : index
    %c0_61 = arith.constant 0 : index
    %133 = vector.load %arg19[%c0_60, %c0_61] : memref<1x32xf32, #tpu.memory_space<vmem>>, vector<1x32xf32>
    %134 = vector.broadcast %133 : vector<1x32xf32> to vector<8x32xf32>
    %135 = arith.addf %132, %134 : vector<8x32xf32>
    %136 = arith.addf %86, %135 : vector<8x32xf32>
    %137 = vector.shape_cast %136 : vector<8x32xf32> to vector<1x8x32xf32>
    %c0_62 = arith.constant 0 : index
    %c0_63 = arith.constant 0 : index
    %c0_64 = arith.constant 0 : index
    %138 = vector.load %arg20[%c0_62, %c0_63, %c0_64] : memref<1x8x32xf32, #tpu.memory_space<vmem>>, vector<1x8x32xf32>
    tpu.vector_store %arg20[%c0_62, %c0_63, %c0_64], %137 {strides = array<i32>} : memref<1x8x32xf32, #tpu.memory_space<vmem>>, vector<1x8x32xf32>,
    return
  }
  func.func @transform_0(%arg0: i32) -> (i32, i32, i32) {
    %c0_i32 = arith.constant 0 : i32
    %c0_i32_0 = arith.constant 0 : i32
    %c0_i32_1 = arith.constant 0 : i32
    return %arg0, %c0_i32, %c0_i32_0 : i32, i32, i32
  }
  func.func @transform_1(%arg0: i32) -> (i32, i32, i32) {
    %c0_i32 = arith.constant 0 : i32
    %c0_i32_0 = arith.constant 0 : i32
    %c0_i32_1 = arith.constant 0 : i32
    return %arg0, %c0_i32, %c0_i32_0 : i32, i32, i32
  }
  func.func @transform_2(%arg0: i32) -> (i32, i32) {
    %c0_i32 = arith.constant 0 : i32
    %c0_i32_0 = arith.constant 0 : i32
    %c0_i32_1 = arith.constant 0 : i32
    return %c0_i32, %c0_i32_0 : i32, i32
  }
  func.func @transform_3(%arg0: i32) -> (i32, i32) {
    %c0_i32 = arith.constant 0 : i32
    %c0_i32_0 = arith.constant 0 : i32
    %c0_i32_1 = arith.constant 0 : i32
    return %c0_i32, %c0_i32_0 : i32, i32
  }
  func.func @transform_4(%arg0: i32) -> (i32, i32) {
    %c0_i32 = arith.constant 0 : i32
    %c0_i32_0 = arith.constant 0 : i32
    %c0_i32_1 = arith.constant 0 : i32
    return %c0_i32, %c0_i32_0 : i32, i32
  }
  func.func @transform_5(%arg0: i32) -> (i32, i32) {
    %c0_i32 = arith.constant 0 : i32
    %c0_i32_0 = arith.constant 0 : i32
    %c0_i32_1 = arith.constant 0 : i32
    return %c0_i32, %c0_i32_0 : i32, i32
  }
  func.func @transform_6(%arg0: i32) -> (i32, i32) {
    %c0_i32 = arith.constant 0 : i32
    %c0_i32_0 = arith.constant 0 : i32
    %c0_i32_1 = arith.constant 0 : i32
    return %c0_i32, %c0_i32_0 : i32, i32
  }
  func.func @transform_7(%arg0: i32) -> (i32, i32) {
    %c0_i32 = arith.constant 0 : i32
    %c0_i32_0 = arith.constant 0 : i32
    %c0_i32_1 = arith.constant 0 : i32
    return %c0_i32, %c0_i32_0 : i32, i32
  }
  func.func @transform_8(%arg0: i32) -> (i32, i32) {
    %c0_i32 = arith.constant 0 : i32
    %c0_i32_0 = arith.constant 0 : i32
    %c0_i32_1 = arith.constant 0 : i32
    return %c0_i32, %c0_i32_0 : i32, i32
  }
  func.func @transform_9(%arg0: i32) -> (i32, i32) {
    %c0_i32 = arith.constant 0 : i32
    %c0_i32_0 = arith.constant 0 : i32
    %c0_i32_1 = arith.constant 0 : i32
    return %c0_i32, %c0_i32_0 : i32, i32
  }
  func.func @transform_10(%arg0: i32) -> (i32, i32) {
    %c0_i32 = arith.constant 0 : i32
    %c0_i32_0 = arith.constant 0 : i32
    %c0_i32_1 = arith.constant 0 : i32
    return %c0_i32, %c0_i32_0 : i32, i32
  }
  func.func @transform_11(%arg0: i32) -> (i32, i32) {
    %c0_i32 = arith.constant 0 : i32
    %c0_i32_0 = arith.constant 0 : i32
    %c0_i32_1 = arith.constant 0 : i32
    return %c0_i32, %c0_i32_0 : i32, i32
  }
  func.func @transform_12(%arg0: i32) -> (i32, i32) {
    %c0_i32 = arith.constant 0 : i32
    %c0_i32_0 = arith.constant 0 : i32
    %c0_i32_1 = arith.constant 0 : i32
    return %c0_i32, %c0_i32_0 : i32, i32
  }
  func.func @transform_13(%arg0: i32) -> (i32, i32) {
    %c0_i32 = arith.constant 0 : i32
    %c0_i32_0 = arith.constant 0 : i32
    %c0_i32_1 = arith.constant 0 : i32
    return %c0_i32, %c0_i32_0 : i32, i32
  }
  func.func @transform_14(%arg0: i32) -> (i32, i32) {
    %c0_i32 = arith.constant 0 : i32
    %c0_i32_0 = arith.constant 0 : i32
    %c0_i32_1 = arith.constant 0 : i32
    return %c0_i32, %c0_i32_0 : i32, i32
  }
  func.func @transform_15(%arg0: i32) -> (i32, i32) {
    %c0_i32 = arith.constant 0 : i32
    %c0_i32_0 = arith.constant 0 : i32
    %c0_i32_1 = arith.constant 0 : i32
    return %c0_i32, %c0_i32_0 : i32, i32
  }
  func.func @transform_16(%arg0: i32) -> (i32, i32) {
    %c0_i32 = arith.constant 0 : i32
    %c0_i32_0 = arith.constant 0 : i32
    %c0_i32_1 = arith.constant 0 : i32
    return %c0_i32, %c0_i32_0 : i32, i32
  }
  func.func @transform_17(%arg0: i32) -> (i32, i32) {
    %c0_i32 = arith.constant 0 : i32
    %c0_i32_0 = arith.constant 0 : i32
    %c0_i32_1 = arith.constant 0 : i32
    return %c0_i32, %c0_i32_0 : i32, i32
  }
  func.func @transform_18(%arg0: i32) -> (i32, i32) {
    %c0_i32 = arith.constant 0 : i32
    %c0_i32_0 = arith.constant 0 : i32
    %c0_i32_1 = arith.constant 0 : i32
    return %c0_i32, %c0_i32_0 : i32, i32
  }
  func.func @transform_19(%arg0: i32) -> (i32, i32, i32) {
    %c0_i32 = arith.constant 0 : i32
    %c0_i32_0 = arith.constant 0 : i32
    %c0_i32_1 = arith.constant 0 : i32
    return %arg0, %c0_i32, %c0_i32_0 : i32, i32, i32
  }
}

</mosaic_0001>

<bundles_post_ra>
// kernel: tpu_custom_call.1
= control target key start
LH: loop header
LB: loop body
LE: loop exit
PB: predicated region body
PF: predicated region fallthrough
CT: control target
= control target key end

     0   :  { %s3377_s0 = inlined_call_operand.vmem [shape: f32[2,8,32], index: 0, kind: input, shape index: {}]   ;;  %s3378_s1 = inlined_call_operand.hbm [shape: f32[2,1,8], index: 1, kind: input, shape index: {}]   ;;  %s3379_s2 = inlined_call_operand.hbm [shape: f32[8,8], index: 2, kind: input, shape index: {}]   ;;  %s3380_s3 = inlined_call_operand.vmem [shape: f32[1,32], index: 3, kind: input, shape index: {}]   ;;  %s3381_s4 = inlined_call_operand.vmem [shape: f32[1,32], index: 4, kind: input, shape index: {}]   ;;  %s3382_s5 = inlined_call_operand.vmem [shape: bf16[32,32], index: 5, kind: input, shape index: {}]   ;;  %s3383_s6 = inlined_call_operand.vmem [shape: f32[1,32], index: 6, kind: input, shape index: {}]   ;;  %s3384_s7 = inlined_call_operand.vmem [shape: bf16[32,32], index: 7, kind: input, shape index: {}]   ;;  %s3385_s8 = inlined_call_operand.vmem [shape: f32[1,32], index: 8, kind: input, shape index: {}]   ;;  %s3386_s9 = inlined_call_operand.vmem [shape: bf16[32,32], index: 9, kind: input, shape index: {}]   ;;  %s3387_s10 = inlined_call_operand.vmem [shape: f32[1,32], index: 10, kind: input, shape index: {}]   ;;  %s3388_s11 = inlined_call_operand.vmem [shape: bf16[32,32], index: 11, kind: input, shape index: {}]   ;;  %s3389_s12 = inlined_call_operand.vmem [shape: f32[1,32], index: 12, kind: input, shape index: {}]   ;;  %s3390_s13 = inlined_call_operand.vmem [shape: f32[1,32], index: 13, kind: input, shape index: {}]   ;;  %s3391_s14 = inlined_call_operand.vmem [shape: f32[1,32], index: 14, kind: input, shape index: {}]   ;;  %s3392_s15 = inlined_call_operand.hbm [shape: bf16[32,128], index: 15, kind: input, shape index: {}]   ;;  %s3393_s16 = inlined_call_operand.vmem [shape: f32[1,128], index: 16, kind: input, shape index: {}]   ;;  %s3394_s17 = inlined_call_operand.vmem [shape: bf16[128,32], index: 17, kind: input, shape index: {}]   ;;  %s3395_s18 = inlined_call_operand.vmem [shape: f32[1,32], index: 18, kind: input, shape index: {}]   ;;  %s3396_s19 = inlined_call_operand.hbm [shape: f32[2,8,32], index: 19, kind: output, shape index: {}]  }
   0x1   :  { %3411 = sst [smem:[#allocation19_spill]] %s3377_s0 }
   0x2   :  { %3412 = sst [smem:[#allocation20_spill]] %s3378_s1 }
   0x3   :  { %3413 = sst [smem:[#allocation21_spill]] %s3379_s2 }
   0x4   :  { %3414 = sst [smem:[#allocation22_spill]] %s3380_s3 }
   0x5   :  { %3415 = sst [smem:[#allocation23_spill]] %s3392_s15 }
   0x6   :  { %3416 = sst [smem:[#allocation24_spill]] %s3393_s16 }
   0x7   :  { %3417 = sst [smem:[#allocation25_spill]] %s3395_s18 }
   0x8   :  { %3418 = sst [smem:[#allocation26_spill]] %s3396_s19 }
   0x9   :  { %24 = vsyncpa [#allocation3], 0 }
   0xa   :  { %26 = vsyncpa [#allocation3 + $0x1], 0 }
   0xb   :  { %27 = vsyncpa [#allocation6], 0 }
   0xc   :  { %28 = vsyncpa [#allocation4], 0 }
   0xd   :  { %30 = vsyncpa [#allocation4 + $0x1], 0  ;;  %s2919_s0 = smov 0   ;;  %s2921_s30 = smov 0  }
   0xe   :  { %s2923_s20 = smov 0   ;;  %s2925_s21 = smov 0  }
   0xf LB: > { %3419 = sst [smem:[#allocation12_spill]] %s2789_s0  ;;  %s2940_s1 = sadd.s32 4294967295, %s2801_s21   ;;  %s2801_s21 = sphi %s2925_s21, %s3452_s21   ;;  %s2797_s20 = sphi %s2923_s20, %s3454_s20   ;;  %s2793_s30 = sphi %s2921_s30, %s3456_s30   ;;  %s2789_s0 = sphi %s2919_s0, %s3455_s0  }
  0x10   : > { %3420 = sst [smem:[#allocation13_spill]] %s2797_s20  ;;  %s2321_s22 = sadd.s32 4294967294, %s2801_s21  }
  0x11   : > { %3421 = sst [smem:[#allocation14_spill]] %s2801_s21  ;;  %p82_p0 = scmp.ne.s32.totalorder %s2793_s30, %s2789_s0 }
  0x12   : > { %p3399_p1 = scmp.eq.s32.totalorder %s2940_s1, 0  ;;  %p469_p3 = scmp.eq.s32.totalorder %s2321_s22, 1 }
  0x13   : > { %p2322_p5 = scmp.ge.s32.totalorder %s2801_s21, 1  ;;  %p476_p7 = scmp.lt.s32.totalorder %s2801_s21, 3 }
  0x14   : > { %p2949_p4 = por %p3399_p1, %p82_p0  ;;  %p2954_p6 = por %p469_p3, %p82_p0 }
  0x15   : > { %p2959_p8 = pnand %p2322_p5, %p476_p7  ;;  %s2803_s25 = smov [#allocation5]  }
  0x16   : > { %s3422_s2 = scalar_select %p2949_p4, 1, 0 }
  0x17   : > { %s3423_s23 = scalar_select %p2954_p6, 1, 0 }
  0x18   : > { %s3425_s24 = scalar_select %p2959_p8, 1, 0 }
  0x19   : > { %3424 = sst [smem:[#allocation15_spill]] %s3423_s23  ;;  %s489_s3 = sshll.u32 %s2803_s25, 4  ;;  %s490_s3 = int_to_ptr.vmem [resolvable:$true] %s489_s3 }
  0x1a   : > { %p2546_p10 = pneg %p2959_p8  ;;  %s2804_s26 = smov [#allocation7]  }
  0x1b   : > { %s535_s27 = sshll.u32 %s2804_s26, 4  ;;  %s2664_s29 = scalar_lea.vmem %s490_s3, 128  ;;  %s536_s27 = int_to_ptr.vmem [resolvable:$true] %s535_s27 }
  0x1c   : > { %p2968_p11 = pnand %p2546_p10, %p3399_p1  ;;  %p2665_p13 = scmp.ne.s32.totalorder %s490_s3, %s2664_s29 }
  0x1d   : > { %p2672_p5 = scmp.lt.s32.totalorder %s490_s3, %s490_s3  ;;  %p2673_p7 = scmp.lt.s32.totalorder %s2664_s29, %s2664_s29 }
  0x1e   : > { %p2655_p12 = pneg %p2968_p11 }
  0x1f   : > { %p2674_p9 = por %p2673_p7, %p2672_p5 }
  0x20   : > { %p2667_p0 = pnand %p2665_p13, %p2655_p12 }
  0x22   : > { %p2668_p3 = pneg %p2667_p0 }
  0x24   : > { %p2675_p2 = pnand %p2674_p9, %p2668_p3 }
  0x26   : > { %2678 = shalt.err (!%p2675_p2)
}
  0x27   : > { %s3427_s26 = sld [smem:[#allocation21_spill]]  ;;  %s2690_s23 = scalar_lea.vmem %s536_s27, 256 }
  0x28   : > { %p2691_p10 = scmp.ne.s32.totalorder %s536_s27, %s2690_s23  ;;  %p2698_p13 = scmp.lt.s32.totalorder %s536_s27, %s536_s27 }
  0x29   : > { %p2699_p0 = scmp.lt.s32.totalorder %s2690_s23, %s2690_s23 }
  0x2a   : > { %p2693_p1 = pnand %p2691_p10, %p2655_p12 }
  0x2b   : > { %p2700_p4 = por %p2699_p0, %p2698_p13 }
  0x2c   : > { %p2694_p6 = pneg %p2693_p1 }
  0x2d   : > { %2549 = dma.hbm_to_vmem [thread:$0]  (!%p2968_p11), %s3427_s26, 128, %s490_s3, [#allocation6]  }
  0x2e   : > { %p2701_p8 = pnand %p2700_p4, %p2694_p6 }
  0x30   : > { %2704 = shalt.err (!%p2701_p8)
}
  0x31   : > { %s2805_s29 = smov 64   ;;  %s2806_s3 = smov 4  }
  0x32   : > { %s3428_s15 = sld [smem:[#allocation23_spill]]  ;;  %s2991_s25 = sadd.s32 1, %s2801_s21  }
  0x33   : > { %3429 = sst [smem:[#allocation16_spill]] %s2991_s25  ;;  %s69_s26 = sadd.s32 1, %s2797_s20 }
  0x34   : > { %s66_s0 = ssub.s32 %s2801_s21, %s2991_s25  ;;  %p76_p1 = scmp.ne.s32.totalorder %s2797_s20, %s2793_s30 }
  0x35   : > { %p67_p2 = scmp.eq.s32.totalorder %s66_s0, 0  ;;  %p77_p4 = scmp.eq.s32.totalorder %s2801_s21, 0 }
  0x36   : > { %p3430_p6 = scmp.eq.s32.totalorder %s2940_s1, 1  ;;  %p2563_p9 = scmp.lt.s32.totalorder %s2801_s21, 2 }
  0x37   : > { %s3007_s18 = scalar_select %p67_p2, %s2797_s20, %s69_s26  }
  0x38   : > { %2552 = dma.hbm_to_vmem [thread:$0]  (!%p2968_p11), %s3428_s15, 256, %s536_s27, [#allocation6], %s2805_s29, %s2805_s29, %s2806_s3  }
  0x39   : > { %p3001_p8 = por %p3430_p6, %p76_p1  ;;  %3433 = sst [smem:[#allocation18_spill]] %s3007_s18 }
  0x3a   : > { %p78_p12 = por %p77_p4, %p76_p1  ;;  %s565_s28 = sand.u32 1, %s2797_s20  }
  0x3b   : > { %s3431_s19 = scalar_select %p3001_p8, 1, 0 }
  0x3c   : > { %s2326_s22 = sshll.u32 %s2801_s21, 4  ;;  %s568_s27 = scalar_lea.vmem [#allocation2], %s565_s28 }
  0x3d   : > { %3432 = sst [smem:[#allocation17_spill]] %s3431_s19  ;;  %s575_s29 = sshll.u32 %s568_s27, 4  ;;  %s576_s29 = int_to_ptr.vmem [resolvable:$true] %s575_s29 }
  0x3e   : > { %s3434_s15 = sld [smem:[#allocation20_spill]]  ;;  %p3016_p11 = pnand %p2563_p9, %p78_p12 }
  0x3f   : > { %s566_s26 = scalar_lea.sflag [#allocation3], %s565_s28 }
  0x40   : > { %p2707_p5 = pneg %p3016_p11 }
  0x44   : > { %s3014_s25 = scalar_lea.hbm %s3434_s15, %s2326_s22  ;;  %s2710_s22 = scalar_lea.hbm %s3434_s15, 32 }
  0x45   : > { %s2705_s18 = scalar_lea.hbm %s3014_s25, 16  ;;  %p2711_p13 = scmp.lt.s32.totalorder %s3014_s25, %s3434_s15 }
  0x46   : > { %p2706_p3 = scmp.ne.s32.totalorder %s3014_s25, %s2705_s18  ;;  %p2712_p0 = scmp.lt.s32.totalorder %s2710_s22, %s2705_s18 }
  0x48   : > { %p2708_p7 = pnand %p2707_p5, %p2706_p3  ;;  %p2713_p1 = por %p2712_p0, %p2711_p13 }
  0x4a   : > { %p2709_p10 = pneg %p2708_p7 }
  0x4c   : > { %p2714_p2 = pnand %p2713_p1, %p2709_p10 }
  0x4e   : > { %2717 = shalt.err (!%p2714_p2)
}
  0x4f   : > { %s2718_s21 = scalar_lea.vmem %s576_s29, 16  ;;  %s2807_s28 = smov [#allocation2]  }
  0x50   : > { %p2719_p4 = scmp.ne.s32.totalorder %s576_s29, %s2718_s21  ;;  %s2723_s19 = sshll.u32 %s2807_s28, 4  ;;  %s2724_s19 = int_to_ptr.vmem [resolvable:$false] %s2723_s19 }
  0x51   : > { %s2725_s16 = scalar_lea.vmem %s2724_s19, 32  ;;  %p2726_p12 = scmp.lt.s32.totalorder %s576_s29, %s2724_s19 }
  0x52   : > { %p2721_p6 = pnand %p2719_p4, %p2707_p5  ;;  %p2727_p3 = scmp.lt.s32.totalorder %s2725_s16, %s2718_s21 }
  0x54   : > { %p2722_p9 = pneg %p2721_p6  ;;  %p2728_p7 = por %p2727_p3, %p2726_p12 }
  0x56   : > { %p2729_p8 = pnand %p2728_p7, %p2722_p9 }
  0x58   : > { %2732 = shalt.err (!%p2729_p8)
}
  0x59   : > { %2556 = dma.hbm_to_vmem [thread:$0]  (!%p3016_p11), %s3014_s25, 16, %s576_s29, %s566_s26  }
  0x5a   : > { %p3436_p10 = scmp.ne.s32.totalorder %s3425_s24, 0 }
  0x5b   : > { %s3037_s18 = sand.u32 (!%p3436_p10), 1, %s2793_s30   ;;  %p3437_p5 = scmp.ne.s32.totalorder (!%p3436_p10), %s3422_s2, 0 }
  0x5c   : > { %584 = sbr.rel (%p3436_p10) target bundleno = 2616 (0xa38), region = 96  ;;  %s587_s20 = scalar_lea.sflag (!%p3436_p10), [#allocation3], %s3037_s18 }
  0x5d   : > { %s589_s27 = scalar_lea.vmem (!%p3436_p10), [#allocation2], %s3037_s18 }
  0x61   : > { %2776 = dma.done.wait (%p3437_p5), %s587_s20, 16  }
  0x62   : > { %2778 = vsyncadd (%p3437_p5), %s587_s20, 4294967280  ;;  %p3438_p8 = scmp.eq.s32.totalorder %s2940_s1, 0 }
  0x64   : > { %2780 = dma.done.wait (%p3438_p8), [#allocation6], 384   ;;  %p3439_p11 = pmov %p3438_p8 }
  0x65   : > { %p655_p13 = scmp.lt.s32.totalorder %s2940_s1, 1  ;;  %s3440_s25 = sld [smem:[#allocation19_spill]]  ;;  %vm663_vm0 = vcmask 261120   ;;  %v2613_v7 = vld [vmem:[%s3382_s5 + $0x8] sm:$0xff]   ;;  %v2808_v8 = vmov 0.0   ;;  %vm2809_vm1 = vmmov 0   ;;  %v902_v42 = vlaneseq }
  0x66   : > { %2782 = vsyncadd (%p3439_p11), [#allocation6], 4294966912  ;;  %2426 = vmatprep.subr.bf16.mxu0 %v2808_v8  ;;  %2430 = vmatprep.mubr.msk.bf16.mxu0 %vm2809_vm1, %v2808_v8  ;;  %v2614_v9 = vld [vmem:[%s3382_s5] sm:$0xff]   ;;  %s3441_s28 = sld [smem:[#allocation22_spill]]  ;;  %v2615_v19 = vld [vmem:[%s3384_s7 + $0x8] sm:$0xff]   ;;  %s2810_s23 = smov 104  }
  0x67   : > { %s656_s16 = scalar_select %p655_p13, %s2940_s1, 1  ;;  %2427 = vmatpush3.bf16.msra.mxu0 %v2613_v7  ;;  %2450 = vmatprep.subr.bf16.mxu1 %v2808_v8  ;;  %v2333_v16 = vld [vmem:[%s3381_s4] ss:$0 sm:$0xff]  ;;  %v2617_v22 = vld [vmem:[%s3386_s9 + $0x8] sm:$0xff]   ;;  %v2813_v40 = vmov 1983009808  }
  0x68   : > { %2428 = vmatprep.subr.bf16.mxu0 %v2808_v8  ;;  %2452 = vmatprep.mubr.msk.bf16.mxu1 %vm2809_vm1, %v2808_v8  ;;  %v2616_v21 = vld [vmem:[%s3384_s7] sm:$0xff]   ;;  %v900_v41 = vunpack.c.l.s4 %v2813_v40  ;;  %v2814_v43 = vmov 1934713408   ;;  %v903_v46 = vshrl.u32 %v902_v42, 7  ;;  %vm1337_vm2 = vcmask 64512   ;;  %s2815_s0 = smov 16  }
  0x69   : > { %s2331_s19 = sshll.u32 %s656_s16, 3  ;;  %v2618_v23 = vld [vmem:[%s3386_s9] sm:$0xff]   ;;  %v932_v44 = vunpack.c.l.s4 %v2814_v43  ;;  %vm1587_vm3 = vcmask 1043456   ;;  %s2816_s26 = smov 8   ;;  %vm1918_vm4 = vcmask 130048   ;;  %vm1920_vm5 = vcmask 195584  }
  0x6a   : > { %v2338_v28 = vld [vmem:[%s3385_s8] ss:$0 sm:$0xff]  ;;  %v901_v45 = vunpack.c.0.s8 %v900_v41  ;;  %s2817_s3 = smov 24   ;;  %s2383_s22 = sshll.u32 %s2940_s1, 7 }
  0x6b   : > { %s658_s29 = scalar_lea.vmem %s3440_s25, %s2331_s19  ;;  %2429 = vmatpush3.bf16.msra.mxu0 %v2614_v9  ;;  %v2334_v33 = vld [vmem:[%s3383_s6] ss:$0 sm:$0xff]  ;;  %s2812_s19 = smov 112   ;;  %v933_v49 = vunpack.c.0.s8 %v932_v44 }
  0x6c   : > { %v3054_v0 = vld [vmem:[%s658_s29] sm:$0xff]  ;;  %2434 = vmatprep.subr.bf16.mxu0 %v2808_v8  ;;  %v3119_v50 = vsub.s32 %v901_v45, %v903_v46  ;;  %s3442_s25 = sld [smem:[#allocation24_spill]]  ;;  %s2330_s29 = sshll.u32 %s3037_s18, 3 }
  0x6d   : > { %v664_v1 = vsel %vm663_vm0, %v3054_v0, 0.0  ;;  %v2332_v14 = vld [vmem:[%s3441_s28] ss:$0 sm:$0xff]  ;;  %s2811_s28 = smov 120   ;;  %v3121_v56 = vsub.s32 %v933_v49, %v903_v46  ;;  %s2210_s1 = scalar_lea.sflag [#allocation4], %s3037_s18 }
  0x6e   : > { %665 = vadd.xlane.f32.xlu0 %v664_v1  ;;  %s2818_s24 = smov [#allocation8]  }
  0xf7   : > { %v666_v2 = vpop.xlane.xlu0 %665 }
  0xf8   : > { %v668_v3 = vmul.f32 0.03125, %v666_v2 }
  0xfa   : > { %v669_v4 = vsub.f32 %v3054_v0, %v668_v3 }
  0xfc   : > { %v670_v5 = vmul.f32 %v669_v4, %v669_v4 }
  0xfe   : > { %v671_v6 = vsel %vm663_vm0, %v670_v5, 0.0 }
  0xff   : > { %672 = vadd.xlane.f32.xlu0 %v671_v6 }
 0x188   : > { %v673_v10 = vpop.xlane.xlu0 %672 }
 0x189   : > { %v674_v11 = vmul.f32 0.03125, %v673_v10 }
 0x18b   : > { %v675_v12 = vadd.f32 1e-05, %v674_v11 }
 0x18d   : > { %2631 = vrsqrt.f32 %v675_v12 }
 0x19a   : > { %v2632_v13 = vpop.eup %2631 }
 0x19b   : > { %v677_v15 = vmul.f32 %v2632_v13, %v669_v4 }
 0x19d   : > { %v684_v17 = vmul.f32 %v2332_v14, %v677_v15 }
 0x19f   : > { %v691_v18 = vadd.f32 %v2333_v16, %v684_v17 }
 0x1a1   : > { %v692_v20 = vpack.c.bf16 %v691_v18, %v691_v18 }
 0x1a3   : > { %2431 = vmatmul.mubr.msk.bf16.vlgmr.msra.gmra.mxu0 %vm663_vm0, %v692_v20 }
 0x1a4   : > { %2435 = vmatpush3.bf16.msra.mxu0 %v2615_v19  ;;  %2438 = vmatprep.mubr.msk.bf16.mxu0 %vm2809_vm1, %v2808_v8 }
 0x1a5   : > { %2436 = vmatprep.subr.bf16.mxu0 %v2808_v8 }
 0x1a8   : > { %2437 = vmatpush3.bf16.msra.mxu0 %v2616_v21 }
 0x1a9   : > { %2442 = vmatprep.subr.bf16.mxu0 %v2808_v8 }
 0x1ab   : > { %2439 = vmatmul.mubr.msk.bf16.vlgmr.msra.gmra.mxu0 %vm663_vm0, %v692_v20 }
 0x1ac   : > { %2443 = vmatpush3.bf16.msra.mxu0 %v2617_v22  ;;  %2446 = vmatprep.mubr.msk.bf16.mxu0 %vm2809_vm1, %v2808_v8 }
 0x1ad   : > { %2444 = vmatprep.subr.bf16.mxu0 %v2808_v8 }
 0x1b0   : > { %2445 = vmatpush3.bf16.msra.mxu0 %v2618_v23 }
 0x1b1   : > { %2456 = vmatprep.subr.bf16.mxu0 %v2808_v8 }
 0x1b3   : > { %2447 = vmatmul.mubr.msk.bf16.vlgmr.msra.gmra.mxu0 %vm663_vm0, %v692_v20 }
 0x1b4   : > { %2458 = vmatprep.mubr.msk.bf16.mxu0 %vm2809_vm1, %v2808_v8 }
 0x263   : > { %v753_v24 = vpop.f32.mrf.mxu0 }
 0x264   : > { %v754_v36 = vadd.f32 %v2334_v33, %v753_v24 }
 0x265   : > { %v2432_v25 = vpop.f32.mrf.mxu0 }
 0x267   : > { %v756_v26 = vpop.f32.mrf.mxu0 }
 0x269   : > { %v2433_v27 = vpop.f32.mrf.mxu0 }
 0x26b   : > { %v816_v29 = vpop.f32.mrf.mxu0 }
 0x26c   : > { %v817_v30 = vadd.f32 %v2338_v28, %v816_v29 }
 0x26d   : > { %v2440_v31 = vpop.f32.mrf.mxu0 }
 0x26e   : > { %1044 = vrot.lane.b32.xlu0 %v817_v30, %s2810_s23  ;;  %1038 = vrot.lane.b32.xlu1 %v817_v30, %s2811_s28 }
 0x26f   : > { %v819_v32 = vpop.f32.mrf.mxu0 }
 0x271   : > { %v2441_v34 = vpop.f32.mrf.mxu0 }
 0x272   : > { %1041 = vrot.lane.b32.xlu1 %v817_v30, %s2812_s19 }
 0x273   : > { %v3114_v35 = vpop.f32.mrf.mxu0 }
 0x275   : > { %v2448_v37 = vpop.f32.mrf.mxu0 }
 0x276   : > { %888 = vrot.lane.b32.xlu1 %v754_v36, %s2811_s28 }
 0x277   : > { %v882_v38 = vpop.f32.mrf.mxu0 }
 0x279   : > { %v2449_v39 = vpop.f32.mrf.mxu0 }
 0x27a   : > { %891 = vrot.lane.b32.xlu1 %v754_v36, %s2812_s19 }
 0x27e   : > { %894 = vrot.lane.b32.xlu1 %v754_v36, %s2810_s23 }
 0x2e0   : > { %v1045_v47 = vpop.permute.xlu0 %1044  ;;  %v1039_v48 = vpop.permute.xlu1 %1038 }
 0x2e1   : > { %v1063_v51 = vcombine.low %v1039_v48, %v1045_v47  ;;  %v1064_v52 = vcombine.high %v1039_v48, %v1045_v47 }
 0x2e3   : > { %v1071_v57 = vrot.slane %v1063_v51, %v3119_v50  ;;  %v1078_v58 = vrot.slane %v1064_v52, %v3119_v50 }
 0x2e4   : > { %v1042_v53 = vpop.permute.xlu1 %1041 }
 0x2e5   : > { %v1047_v54 = vcombine.low %v817_v30, %v1042_v53  ;;  %v1048_v55 = vcombine.high %v817_v30, %v1042_v53 }
 0x2e7   : > { %v1055_v59 = vrot.slane %v1047_v54, %v3119_v50  ;;  %v1062_v60 = vrot.slane %v1048_v55, %v3119_v50 }
 0x2e8   : > { %v889_v61 = vpop.permute.xlu1 %888 }
 0x2e9   : > { %v1079_v62 = vcombine.low %v1055_v59, %v1071_v57  ;;  %v1080_v63 = vcombine.high %v1055_v59, %v1071_v57  ;;  %v1095_v1 = vcombine.low %v1062_v60, %v1078_v58  ;;  %v1096_v2 = vcombine.high %v1062_v60, %v1078_v58 }
 0x2eb   : > { %v1087_v3 = vrot.slane %v1079_v62, %v3121_v56  ;;  %v1094_v4 = vrot.slane %v1080_v63, %v3121_v56  ;;  %v1103_v5 = vrot.slane %v1095_v1, %v3121_v56  ;;  %v1110_v6 = vrot.slane %v1096_v2, %v3121_v56 }
 0x2ec   : > { %v892_v7 = vpop.permute.xlu1 %891 }
 0x2ed   : > { %v1115_v9 = vcombine.low %v1087_v3, %v1094_v4  ;;  %v2348_v10 = vcombine.high %v1087_v3, %v1094_v4  ;;  %v1131_v11 = vcombine.low %v1103_v5, %v1110_v6  ;;  %v2349_v12 = vcombine.high %v1103_v5, %v1110_v6 }
 0x2ee   : > { %v897_v13 = vcombine.low %v754_v36, %v892_v7  ;;  %v898_v14 = vcombine.high %v754_v36, %v892_v7 }
 0x2ef   : > { %v1122_v15 = vrot.slane %v1115_v9, %v3119_v50  ;;  %v1130_v16 = vrot.slane %v2348_v10, %v3119_v50  ;;  %v1138_v17 = vrot.slane %v1131_v11, %v3119_v50  ;;  %v1146_v18 = vrot.slane %v2349_v12, %v3119_v50 }
 0x2f0   : > { %v895_v19 = vpop.permute.xlu1 %894  ;;  %v905_v24 = vrot.slane %v897_v13, %v3119_v50  ;;  %v912_v25 = vrot.slane %v898_v14, %v3119_v50 }
 0x2f1   : > { %v913_v20 = vcombine.low %v889_v61, %v895_v19  ;;  %v914_v21 = vcombine.high %v889_v61, %v895_v19  ;;  %v1147_v22 = vcombine.low %v1122_v15, %v1130_v16  ;;  %v1163_v23 = vcombine.low %v1138_v17, %v1146_v18  ;;  %v885_v19 = vld [vmem:[#allocation5] sm:$0xff] }
 0x2f2   : > { %v1148_v30 = vcombine.high %v1122_v15, %v1130_v16  ;;  %v1164_v31 = vcombine.high %v1138_v17, %v1146_v18 }
 0x2f3   : > { %v921_v26 = vrot.slane %v913_v20, %v3119_v50  ;;  %v928_v27 = vrot.slane %v914_v21, %v3119_v50  ;;  %v1155_v28 = vrot.slane %v1147_v22, %v3121_v56  ;;  %v1171_v29 = vrot.slane %v1163_v23, %v3121_v56  ;;  %v2356_v22 = vld [vmem:[%s589_s27] ss:$0 sm:$0xff] }
 0x2f4   : > { %v1162_v45 = vrot.slane %v1148_v30, %v3121_v56  ;;  %v1178_v46 = vrot.slane %v1164_v31, %v3121_v56 }
 0x2f5   : > { %v929_v32 = vcombine.low %v905_v24, %v921_v26  ;;  %v930_v33 = vcombine.high %v905_v24, %v921_v26  ;;  %v945_v34 = vcombine.low %v912_v25, %v928_v27  ;;  %v946_v36 = vcombine.high %v912_v25, %v928_v27 }
 0x2f6   : > { %v1179_v37 = vcombine.low %v1155_v28, %v1171_v29  ;;  %v1180_v38 = vcombine.high %v1155_v28, %v1171_v29  ;;  %v1181_v61 = vcombine.low %v1162_v45, %v1178_v46  ;;  %v1182_v62 = vcombine.high %v1162_v45, %v1178_v46 }
 0x2f7   : > { %v937_v39 = vrot.slane %v929_v32, %v3121_v56  ;;  %v944_v40 = vrot.slane %v930_v33, %v3121_v56  ;;  %v953_v41 = vrot.slane %v945_v34, %v3121_v56  ;;  %v960_v42 = vrot.slane %v946_v36, %v3121_v56 }
 0x2f8   : > { %v1183_v43 = vpack.c.bf16 %v1179_v37, %v1179_v37  ;;  %v1184_v44 = vpack.c.bf16 %v1180_v38, %v1180_v38  ;;  %v1185_v6 = vpack.c.bf16 %v1181_v61, %v1181_v61  ;;  %v1186_v7 = vpack.c.bf16 %v1182_v62, %v1182_v62 }
 0x2f9   : > { %v965_v47 = vcombine.low %v937_v39, %v944_v40  ;;  %v2346_v48 = vcombine.high %v937_v39, %v944_v40  ;;  %v981_v49 = vcombine.low %v953_v41, %v960_v42  ;;  %v2347_v51 = vcombine.high %v953_v41, %v960_v42 }
 0x2fa   : > { %v1342_v52 = vsel %vm1337_vm2, %v1183_v43, 0  ;;  %v1388_v53 = vsel %vm1337_vm2, %v1184_v44, 0  ;;  %v1434_v13 = vsel %vm1337_vm2, %v1185_v6, 0  ;;  %v1480_v14 = vsel %vm1337_vm2, %v1186_v7, 0 }
 0x2fb   : > { %v972_v54 = vrot.slane %v965_v47, %v3119_v50  ;;  %v980_v55 = vrot.slane %v2346_v48, %v3119_v50  ;;  %v988_v57 = vrot.slane %v981_v49, %v3119_v50  ;;  %v996_v58 = vrot.slane %v2347_v51, %v3119_v50  ;;  %2451 = vmatpush3.bf16.xpose.msra.mxu1 %v1342_v52  ;;  %v2342_v51 = vld [vmem:[%s3387_s10] ss:$0 sm:$0xff] }
 0x2fc   : > { %2457 = vmatpush3.bf16.xpose.msra.mxu0 %v1388_v53  ;;  %2462 = vmatprep.subr.bf16.mxu1 %v2808_v8  ;;  %v880_v52 = vadd.f32 %v2342_v51, %v3114_v35 }
 0x2fd   : > { %2468 = vmatprep.subr.bf16.mxu0 %v2808_v8  ;;  %v997_v59 = vcombine.low %v972_v54, %v980_v55  ;;  %v1013_v60 = vcombine.low %v988_v57, %v996_v58  ;;  %v998_v63 = vcombine.high %v972_v54, %v980_v55  ;;  %v1014_v1 = vcombine.high %v988_v57, %v996_v58 }
 0x2ff   : > { %v1005_v2 = vrot.slane %v997_v59, %v3121_v56  ;;  %v1021_v3 = vrot.slane %v1013_v60, %v3121_v56  ;;  %v1012_v11 = vrot.slane %v998_v63, %v3121_v56  ;;  %v1028_v12 = vrot.slane %v1014_v1, %v3121_v56 }
 0x301   : > { %v1029_v4 = vcombine.low %v1005_v2, %v1021_v3  ;;  %v1030_v5 = vcombine.high %v1005_v2, %v1021_v3  ;;  %v1031_v15 = vcombine.low %v1012_v11, %v1028_v12  ;;  %v1032_v16 = vcombine.high %v1012_v11, %v1028_v12 }
 0x303   : > { %v1033_v9 = vpack.c.bf16 %v1029_v4, %v1029_v4  ;;  %v1034_v10 = vpack.c.bf16 %v1030_v5, %v1030_v5  ;;  %v1035_v17 = vpack.c.bf16 %v1031_v15, %v1031_v15  ;;  %v1036_v18 = vpack.c.bf16 %v1032_v16, %v1032_v16 }
 0x305   : > { %2453 = vmatmul.mubr.msk.bf16.vlgmr.msra.gmra.mxu1 %vm1337_vm2, %v1033_v9  ;;  %2459 = vmatmul.mubr.msk.bf16.vlgmr.msra.gmra.mxu0 %vm1337_vm2, %v1034_v10 }
 0x306   : > { %2463 = vmatpush3.bf16.xpose.msra.mxu1 %v1434_v13  ;;  %2469 = vmatpush3.bf16.xpose.msra.mxu0 %v1480_v14 }
 0x307   : > { %2464 = vmatprep.mubr.msk.bf16.mxu1 %vm2809_vm1, %v2808_v8  ;;  %2470 = vmatprep.mubr.msk.bf16.mxu0 %vm2809_vm1, %v2808_v8 }
 0x308   : > { %2474 = vmatprep.subr.bf16.mxu1 %v2808_v8  ;;  %2480 = vmatprep.subr.bf16.mxu0 %v2808_v8 }
 0x30d   : > { %2465 = vmatmul.mubr.msk.bf16.vlgmr.msra.gmra.mxu1 %vm1337_vm2, %v1035_v17  ;;  %2471 = vmatmul.mubr.msk.bf16.vlgmr.msra.gmra.mxu0 %vm1337_vm2, %v1036_v18 }
 0x30e   : > { %2476 = vmatprep.mubr.msk.bf16.mxu1 %vm2809_vm1, %v2808_v8  ;;  %2482 = vmatprep.mubr.msk.bf16.mxu0 %vm2809_vm1, %v2808_v8 }
 0x3c5   : > { %v1378_v20 = vpop.f32.mrf.mxu1  ;;  %v1424_v21 = vpop.f32.mrf.mxu0 }
 0x3c6   : > { %v1522_v23 = vadd.f32 %v1378_v20, %v885_v19  ;;  %v1523_v24 = vadd.f32 %v1424_v21, %v885_v19 }
 0x3c7   : > { %v2454_v25 = vpop.f32.mrf.mxu1  ;;  %v2460_v26 = vpop.f32.mrf.mxu0 }
 0x3c8   : > { %v1532_v27 = vadd.f32 %v2356_v22, %v1522_v23  ;;  %v1533_v28 = vadd.f32 %v2356_v22, %v1523_v24 }
 0x3c9   : > { %v1381_v29 = vpop.f32.mrf.mxu1  ;;  %v1427_v30 = vpop.f32.mrf.mxu0 }
 0x3ca   : > { %v1536_v31 = vsel %vm1337_vm2, %v1532_v27, -inf  ;;  %v1539_v32 = vsel %vm1337_vm2, %v1533_v28, -inf }
 0x3cb   : > { %1537 = vmax.xlane.f32.xlu1 %v1536_v31  ;;  %v2455_v33 = vpop.f32.mrf.mxu1  ;;  %1540 = vmax.xlane.f32.xlu0 %v1539_v32  ;;  %v2461_v34 = vpop.f32.mrf.mxu0 }
 0x3cd   : > { %v1470_v36 = vpop.f32.mrf.mxu1  ;;  %v1516_v37 = vpop.f32.mrf.mxu0 }
 0x3ce   : > { %v1524_v38 = vadd.f32 %v1470_v36, %v885_v19  ;;  %v1525_v39 = vadd.f32 %v1516_v37, %v885_v19 }
 0x3cf   : > { %v2466_v40 = vpop.f32.mrf.mxu1  ;;  %v2472_v41 = vpop.f32.mrf.mxu0 }
 0x3d0   : > { %v1534_v42 = vadd.f32 %v2356_v22, %v1524_v38  ;;  %v1535_v46 = vadd.f32 %v2356_v22, %v1525_v39 }
 0x3d1   : > { %v1473_v43 = vpop.f32.mrf.mxu1  ;;  %v1519_v44 = vpop.f32.mrf.mxu0 }
 0x3d2   : > { %v1542_v45 = vsel %vm1337_vm2, %v1534_v42, -inf  ;;  %v1545_v49 = vsel %vm1337_vm2, %v1535_v46, -inf }
 0x3d3   : > { %1543 = vmax.xlane.f32.xlu1 %v1542_v45  ;;  %v2467_v47 = vpop.f32.mrf.mxu1  ;;  %v2473_v48 = vpop.f32.mrf.mxu0 }
 0x3d7   : > { %1546 = vmax.xlane.f32.xlu1 %v1545_v49 }
 0x3e8   : > { %1191 = vrot.lane.b32.xlu1 %v880_v52, %s2812_s19  ;;  %s3445_s19 = sld [smem:[#allocation26_spill]] }
 0x3ee   : > { %s3333_s27 = scalar_lea.hbm %s3445_s19, %s2383_s22 }
 0x454   : > { %v1538_v53 = vpop.xlane.xlu1 %1537  ;;  %v1541_v54 = vpop.xlane.xlu0 %1540 }
 0x455   : > { %v1548_v55 = vsub.f32 %v1532_v27, %v1538_v53  ;;  %v1549_v57 = vsub.f32 %v1533_v28, %v1541_v54 }
 0x457   : > { %v1552_v58 = vmul.f32 1.442695, %v1548_v55  ;;  %v1554_v59 = vmul.f32 1.442695, %v1549_v57 }
 0x459   : > { %2633 = vpow2.f32 %v1552_v58 }
 0x45a   : > { %2635 = vpow2.f32 %v1554_v59 }
 0x45c   : > { %v1544_v63 = vpop.xlane.xlu1 %1543 }
 0x45d   : > { %v1550_v2 = vsub.f32 %v1534_v42, %v1544_v63 }
 0x45f   : > { %v1556_v4 = vmul.f32 1.442695, %v1550_v2 }
 0x460   : > { %v1547_v1 = vpop.xlane.xlu1 %1546 }
 0x461   : > { %v1551_v3 = vsub.f32 %v1535_v46, %v1547_v1  ;;  %2637 = vpow2.f32 %v1556_v4 }
 0x463   : > { %v1558_v5 = vmul.f32 1.442695, %v1551_v3 }
 0x464   : > { %v1192_v11 = vpop.permute.xlu1 %1191 }
 0x465   : > { %2639 = vpow2.f32 %v1558_v5  ;;  %v1197_v14 = vcombine.low %v880_v52, %v1192_v11  ;;  %v1198_v15 = vcombine.high %v880_v52, %v1192_v11 }
 0x466   : > { %v3186_v60 = vpop.eup %2633 }
 0x467   : > { %v3188_v61 = vpop.eup %2635  ;;  %v1560_v62 = vsel %vm1337_vm2, %v3186_v60, 0.0  ;;  %v1205_v20 = vrot.slane %v1197_v14, %v3119_v50  ;;  %v1212_v21 = vrot.slane %v1198_v15, %v3119_v50 }
 0x468   : > { %1561 = vadd.xlane.f32.xlu0 %v1560_v62  ;;  %v1563_v35 = vsel %vm1337_vm2, %v3188_v61, 0.0 }
 0x469   : > { %1564 = vadd.xlane.f32.xlu1 %v1563_v35 }
 0x46e   : > { %v3196_v6 = vpop.eup %2637 }
 0x46f   : > { %v1566_v9 = vsel %vm1337_vm2, %v3196_v6, 0.0 }
 0x472   : > { %v3198_v7 = vpop.eup %2639 }
 0x473   : > { %v1569_v10 = vsel %vm1337_vm2, %v3198_v7, 0.0 }
 0x47a   : > { %1194 = vrot.lane.b32.xlu1 %v880_v52, %s2810_s23  ;;  %s654_s23 = scalar_lea.vmem [#allocation8], %s2330_s29 }
 0x47e   : > { %1188 = vrot.lane.b32.xlu0 %v880_v52, %s2811_s28  ;;  %s2223_s28 = sshll.u32 %s654_s23, 4  ;;  %s3335_s28 = int_to_ptr.vmem [resolvable:$true] %s2223_s28 }
 0x47f   : > { %s2733_s21 = scalar_lea.vmem %s3335_s28, 128 }
 0x480   : > { %p2734_p0 = scmp.ne.s32.totalorder %s3335_s28, %s2733_s21 }
 0x49d   : > { %1567 = vadd.xlane.f32.xlu0 %v1566_v9 }
 0x49e   : > { %1570 = vadd.xlane.f32.xlu1 %v1569_v10 }
 0x4f1   : > { %v1562_v12 = vpop.xlane.xlu0 %1561 }
 0x4f2   : > { %v1565_v13 = vpop.xlane.xlu1 %1564  ;;  %2641 = vrcp.f32 %v1562_v12 }
 0x4f3   : > { %2643 = vrcp.f32 %v1565_v13 }
 0x4f5   : > { %v1189_v16 = vpop.permute.xlu0 %1188 }
 0x4f6   : > { %v1195_v17 = vpop.permute.xlu1 %1194 }
 0x4f7   : > { %v1213_v18 = vcombine.low %v1189_v16, %v1195_v17  ;;  %v1214_v19 = vcombine.high %v1189_v16, %v1195_v17  ;;  %v2619_v16 = vld [vmem:[%s3388_s11 + $0x8] sm:$0xff]  }
 0x4f9   : > { %v1221_v22 = vrot.slane %v1213_v18, %v3119_v50  ;;  %v1228_v23 = vrot.slane %v1214_v19, %v3119_v50 }
 0x4fb   : > { %v1229_v24 = vcombine.low %v1205_v20, %v1221_v22  ;;  %v1230_v25 = vcombine.high %v1205_v20, %v1221_v22  ;;  %v1245_v26 = vcombine.low %v1212_v21, %v1228_v23  ;;  %v1246_v27 = vcombine.high %v1212_v21, %v1228_v23 }
 0x4fd   : > { %v1237_v28 = vrot.slane %v1229_v24, %v3121_v56  ;;  %v1244_v29 = vrot.slane %v1230_v25, %v3121_v56  ;;  %v1253_v30 = vrot.slane %v1245_v26, %v3121_v56  ;;  %v1260_v31 = vrot.slane %v1246_v27, %v3121_v56 }
 0x4ff   : > { %v1265_v32 = vcombine.low %v1237_v28, %v1244_v29  ;;  %v2350_v33 = vcombine.high %v1237_v28, %v1244_v29  ;;  %v1281_v34 = vcombine.low %v1253_v30, %v1260_v31  ;;  %v2351_v36 = vcombine.high %v1253_v30, %v1260_v31  ;;  %v2642_v45 = vpop.eup %2641 }
 0x500   : > { %v2644_v51 = vpop.eup %2643  ;;  %v1576_v59 = vmul.f32 %v2642_v45, %v3186_v60 }
 0x501   : > { %v1272_v37 = vrot.slane %v1265_v32, %v3119_v50  ;;  %v1280_v38 = vrot.slane %v2350_v33, %v3119_v50  ;;  %v1288_v39 = vrot.slane %v1281_v34, %v3119_v50  ;;  %v1296_v40 = vrot.slane %v2351_v36, %v3119_v50 }
 0x502   : > { %v1577_v62 = vmul.f32 %v2644_v51, %v3188_v61  ;;  %v1580_v3 = vpack.c.bf16 %v1576_v59, %v1576_v59 }
 0x503   : > { %v1297_v41 = vcombine.low %v1272_v37, %v1280_v38  ;;  %v1313_v42 = vcombine.low %v1288_v39, %v1296_v40  ;;  %v1298_v43 = vcombine.high %v1272_v37, %v1280_v38  ;;  %v1314_v44 = vcombine.high %v1288_v39, %v1296_v40 }
 0x504   : > { %v1581_v4 = vpack.c.bf16 %v1577_v62, %v1577_v62 }
 0x505   : > { %v1305_v46 = vrot.slane %v1297_v41, %v3121_v56  ;;  %v1321_v47 = vrot.slane %v1313_v42, %v3121_v56  ;;  %v1312_v48 = vrot.slane %v1298_v43, %v3121_v56  ;;  %v1328_v49 = vrot.slane %v1314_v44, %v3121_v56  ;;  %v2620_v44 = vld [vmem:[%s3388_s11] sm:$0xff]  }
 0x507   : > { %v1329_v52 = vcombine.low %v1305_v46, %v1321_v47  ;;  %v1330_v53 = vcombine.high %v1305_v46, %v1321_v47  ;;  %v1331_v54 = vcombine.low %v1312_v48, %v1328_v49  ;;  %v1332_v55 = vcombine.high %v1312_v48, %v1328_v49 }
 0x509   : > { %v1333_v57 = vpack.c.bf16 %v1329_v52, %v1329_v52  ;;  %v1334_v58 = vpack.c.bf16 %v1330_v53, %v1330_v53  ;;  %v1335_v1 = vpack.c.bf16 %v1331_v54, %v1331_v54  ;;  %v1336_v2 = vpack.c.bf16 %v1332_v55, %v1332_v55 }
 0x50b   : > { %v1589_v35 = vsel %vm1587_vm3, %v1333_v57, 0  ;;  %v1635_v63 = vsel %vm1587_vm3, %v1334_v58, 0  ;;  %v1681_v60 = vsel %vm1587_vm3, %v1335_v1, 0  ;;  %v1727_v61 = vsel %vm1587_vm3, %v1336_v2, 0 }
 0x50c   : > { %2475 = vmatpush3.bf16.msra.mxu1 %v1589_v35  ;;  %2481 = vmatpush3.bf16.msra.mxu0 %v1635_v63 }
 0x50d   : > { %2486 = vmatprep.subr.bf16.mxu1 %v2808_v8  ;;  %2492 = vmatprep.subr.bf16.mxu0 %v2808_v8 }
 0x50f   : > { %2477 = vmatmul.mubr.msk.bf16.vlgmr.msra.gmra.mxu1 %vm1337_vm2, %v1580_v3  ;;  %2483 = vmatmul.mubr.msk.bf16.vlgmr.msra.gmra.mxu0 %vm1337_vm2, %v1581_v4 }
 0x510   : > { %2487 = vmatpush3.bf16.msra.mxu1 %v1681_v60  ;;  %2493 = vmatpush3.bf16.msra.mxu0 %v1727_v61 }
 0x511   : > { %2488 = vmatprep.mubr.msk.bf16.mxu1 %vm2809_vm1, %v2808_v8  ;;  %2494 = vmatprep.mubr.msk.bf16.mxu0 %vm2809_vm1, %v2808_v8 }
 0x512   : > { %2498 = vmatprep.subr.bf16.mxu1 %v2808_v8  ;;  %2506 = vmatprep.subr.bf16.mxu0 %v2808_v8 }
 0x526   : > { %v1568_v5 = vpop.xlane.xlu0 %1567 }
 0x527   : > { %2645 = vrcp.f32 %v1568_v5  ;;  %v1571_v9 = vpop.xlane.xlu1 %1570 }
 0x528   : > { %2647 = vrcp.f32 %v1571_v9 }
 0x534   : > { %v2646_v10 = vpop.eup %2645 }
 0x535   : > { %v2648_v11 = vpop.eup %2647  ;;  %v1578_v12 = vmul.f32 %v2646_v10, %v3196_v6 }
 0x536   : > { %v1579_v13 = vmul.f32 %v2648_v11, %v3198_v7 }
 0x537   : > { %v1582_v14 = vpack.c.bf16 %v1578_v12, %v1578_v12 }
 0x538   : > { %v1583_v15 = vpack.c.bf16 %v1579_v13, %v1579_v13 }
 0x539   : > { %2489 = vmatmul.mubr.msk.bf16.vlgmr.msra.gmra.mxu1 %vm1337_vm2, %v1582_v14 }
 0x53a   : > { %2495 = vmatmul.mubr.msk.bf16.vlgmr.msra.gmra.mxu0 %vm1337_vm2, %v1583_v15  ;;  %2502 = vmatprep.mubr.msk.bf16.mxu1 %vm2809_vm1, %v2808_v8  ;;  %v2363_v15 = vld [vmem:[%s3389_s12] ss:$0 sm:$0xff] }
 0x53b   : > { %2510 = vmatprep.mubr.msk.bf16.mxu0 %vm2809_vm1, %v2808_v8  ;;  %2499 = vmatpush3.bf16.msra.mxu1 %v2619_v16 }
 0x53c   : > { %2500 = vmatprep.subr.bf16.mxu1 %v2808_v8 }
 0x53f   : > { %2501 = vmatpush3.bf16.msra.mxu1 %v2620_v44  ;;  %v2629_v44 = vld [vmem:[%s3394_s17 + $0x8] sm:$0xff]  }
 0x540   : > { %2514 = vmatprep.subr.bf16.mxu1 %v2808_v8 }
 0x5cf   : > { %v1625_v6 = vpop.f32.mrf.mxu1  ;;  %v1671_v7 = vpop.f32.mrf.mxu0 }
 0x5d1   : > { %v2478_v17 = vpop.f32.mrf.mxu1  ;;  %v2484_v18 = vpop.f32.mrf.mxu0 }
 0x5d3   : > { %v1628_v19 = vpop.f32.mrf.mxu1  ;;  %v1674_v20 = vpop.f32.mrf.mxu0 }
 0x5d5   : > { %v2479_v21 = vpop.f32.mrf.mxu1  ;;  %v2485_v22 = vpop.f32.mrf.mxu0 }
 0x5f9   : > { %v1717_v23 = vpop.f32.mrf.mxu1 }
 0x5fa   : > { %v1769_v24 = vcombine.low %v1625_v6, %v1717_v23  ;;  %v1770_v25 = vcombine.high %v1625_v6, %v1717_v23  ;;  %v1763_v26 = vpop.f32.mrf.mxu0 }
 0x5fb   : > { %v1785_v27 = vcombine.low %v1671_v7, %v1763_v26  ;;  %v1786_v28 = vcombine.high %v1671_v7, %v1763_v26  ;;  %v2490_v29 = vpop.f32.mrf.mxu1  ;;  %v2621_v26 = vld [vmem:[#allocation7 + $0x8] sm:$0xff]  }
 0x5fc   : > { %v1777_v30 = vrot.slane %v1769_v24, %v3119_v50  ;;  %v1784_v31 = vrot.slane %v1770_v25, %v3119_v50  ;;  %v2496_v32 = vpop.f32.mrf.mxu0  ;;  %2507 = vmatpush3.bf16.msra.mxu0 %v2621_v26 }
 0x5fd   : > { %v1793_v33 = vrot.slane %v1785_v27, %v3119_v50  ;;  %v1800_v34 = vrot.slane %v1786_v28, %v3119_v50  ;;  %v1720_v36 = vpop.f32.mrf.mxu1  ;;  %v2622_v27 = vld [vmem:[#allocation7] sm:$0xff]   ;;  %2508 = vmatprep.subr.bf16.mxu0 %v2808_v8 }
 0x5fe   : > { %v1766_v37 = vpop.f32.mrf.mxu0 }
 0x5ff   : > { %v1801_v38 = vcombine.low %v1777_v30, %v1793_v33  ;;  %v1802_v39 = vcombine.high %v1777_v30, %v1793_v33  ;;  %v1817_v40 = vcombine.low %v1784_v31, %v1800_v34  ;;  %v1818_v41 = vcombine.high %v1784_v31, %v1800_v34  ;;  %v2491_v42 = vpop.f32.mrf.mxu1  ;;  %v2367_v31 = vld [vmem:[%s3390_s13] ss:$0 sm:$0xff] }
 0x600   : > { %v2497_v43 = vpop.f32.mrf.mxu0  ;;  %2509 = vmatpush3.bf16.msra.mxu0 %v2622_v27  ;;  %v2368_v33 = vld [vmem:[%s3391_s14] ss:$0 sm:$0xff]  ;;  %v2627_v42 = vld [vmem:[%s3394_s17 + $0x18] sm:$0xff]  }
 0x601   : > { %v1809_v45 = vrot.slane %v1801_v38, %v3121_v56  ;;  %v1816_v46 = vrot.slane %v1802_v39, %v3121_v56  ;;  %v1825_v47 = vrot.slane %v1817_v40, %v3121_v56  ;;  %v1832_v48 = vrot.slane %v1818_v41, %v3121_v56  ;;  %v2623_v38 = vld [vmem:[%s3394_s17 + $0x38] sm:$0xff]   ;;  %v2624_v39 = vld [vmem:[%s3394_s17 + $0x30] sm:$0xff]   ;;  %v2625_v40 = vld [vmem:[%s3394_s17 + $0x28] sm:$0xff]  }
 0x602   : > { %v2626_v41 = vld [vmem:[%s3394_s17 + $0x20] sm:$0xff]   ;;  %v2628_v43 = vld [vmem:[%s3394_s17 + $0x10] sm:$0xff]  }
 0x603   : > { %v1837_v49 = vcombine.low %v1809_v45, %v1816_v46  ;;  %v2361_v51 = vcombine.high %v1809_v45, %v1816_v46  ;;  %v1853_v52 = vcombine.low %v1825_v47, %v1832_v48  ;;  %v2362_v53 = vcombine.high %v1825_v47, %v1832_v48  ;;  %v2630_v45 = vld [vmem:[%s3394_s17] sm:$0xff]  }
 0x604   : > { %v2369_v46 = vld [vmem:[%s3442_s25] ss:$0 sm:$0xff]  ;;  %s2737_s25 = sshll.u32 %s2818_s24, 4  ;;  %s2738_s25 = int_to_ptr.vmem [resolvable:$false] %s2737_s25 }
 0x605   : > { %v1844_v54 = vrot.slane %v1837_v49, %v3119_v50  ;;  %v1852_v55 = vrot.slane %v2361_v51, %v3119_v50  ;;  %v1860_v57 = vrot.slane %v1853_v52, %v3119_v50  ;;  %v1868_v58 = vrot.slane %v2362_v53, %v3119_v50  ;;  %s2739_s29 = scalar_lea.vmem %s2738_s25, 256  ;;  %p2740_p6 = scmp.lt.s32.totalorder %s3335_s28, %s2738_s25 }
 0x606   : > { %p2741_p9 = scmp.lt.s32.totalorder %s2739_s29, %s2733_s21 }
 0x607   : > { %v1870_v59 = vcombine.high %v1844_v54, %v1852_v55  ;;  %v1886_v62 = vcombine.high %v1860_v57, %v1868_v58  ;;  %v1869_v35 = vcombine.low %v1844_v54, %v1852_v55  ;;  %v1885_v63 = vcombine.low %v1860_v57, %v1868_v58 }
 0x608   : > { %p2742_p12 = por %p2741_p9, %p2740_p6 }
 0x609   : > { %v1884_v1 = vrot.slane %v1870_v59, %v3121_v56  ;;  %v1900_v2 = vrot.slane %v1886_v62, %v3121_v56  ;;  %v1877_v3 = vrot.slane %v1869_v35, %v3121_v56  ;;  %v1893_v4 = vrot.slane %v1885_v63, %v3121_v56 }
 0x60b   : > { %v1903_v60 = vcombine.low %v1884_v1, %v1900_v2  ;;  %v1902_v61 = vcombine.high %v1877_v3, %v1893_v4  ;;  %v1901_v5 = vcombine.low %v1877_v3, %v1893_v4  ;;  %v1904_v50 = vcombine.high %v1884_v1, %v1900_v2 }
 0x60d   : > { %1910 = vrot.lane.b32.xlu1 %v1903_v60, %s2815_s0  ;;  %1906 = vrot.lane.b32.xlu0 %v1902_v61, %s2816_s26  ;;  %s3443_s26 = sld [smem:[#allocation25_spill]] }
 0x611   : > { %1914 = vrot.lane.b32.xlu0 %v1904_v50, %s2817_s3  ;;  %s3444_s3 = sld [smem:[#allocation17_spill]] }
 0x613   : > { %v2373_v1 = vld [vmem:[%s3443_s26] ss:$0 sm:$0xff] }
 0x617   : > { %p3446_p1 = scmp.ne.s32.totalorder %s3444_s3, 0 }
 0x619   : > { %p2735_p2 = pnand %p2734_p0, %p3446_p1 }
 0x61b   : > { %p2736_p4 = pneg %p2735_p2 }
 0x61d   : > { %p2743_p3 = pnand %p2742_p12, %p2736_p4 }
 0x67f   : > { %v1907_v9 = vpop.permute.xlu0 %1906  ;;  %v1911_v10 = vpop.permute.xlu1 %1910 }
 0x680   : > { %v1917_v11 = vsel %vm1337_vm2, %v1901_v5, %v1907_v9 }
 0x681   : > { %v1919_v13 = vsel %vm1918_vm4, %v1917_v11, %v1911_v10 }
 0x683   : > { %v1915_v12 = vpop.permute.xlu0 %1914 }
 0x684   : > { %v1921_v14 = vsel %vm1920_vm5, %v1919_v13, %v1915_v12 }
 0x685   : > { %v1922_v56 = vpack.c.bf16 %v1921_v14, %v1921_v14 }
 0x687   : > { %2503 = vmatmul.mubr.msk.bf16.vlgmr.msra.gmra.mxu1 %vm663_vm0, %v1922_v56 }
 0x688   : > { %2530 = vmatprep.mubr.msk.bf16.mxu1 %vm2809_vm1, %v2808_v8  ;;  %2515 = vmatpush3.bf16.msra.mxu1 %v2623_v38 }
 0x689   : > { %2516 = vmatprep.subr.bf16.mxu1 %v2808_v8 }
 0x68c   : > { %2517 = vmatpush3.bf16.msra.mxu1 %v2624_v39 }
 0x68d   : > { %2518 = vmatprep.subr.bf16.mxu1 %v2808_v8 }
 0x690   : > { %2519 = vmatpush3.bf16.msra.mxu1 %v2625_v40 }
 0x691   : > { %2520 = vmatprep.subr.bf16.mxu1 %v2808_v8 }
 0x694   : > { %2521 = vmatpush3.bf16.msra.mxu1 %v2626_v41 }
 0x695   : > { %2522 = vmatprep.subr.bf16.mxu1 %v2808_v8 }
 0x698   : > { %2523 = vmatpush3.bf16.msra.mxu1 %v2627_v42 }
 0x699   : > { %2524 = vmatprep.subr.bf16.mxu1 %v2808_v8 }
 0x69c   : > { %2525 = vmatpush3.bf16.msra.mxu1 %v2628_v43 }
 0x69d   : > { %2526 = vmatprep.subr.bf16.mxu1 %v2808_v8 }
 0x6a0   : > { %2527 = vmatpush3.bf16.msra.mxu1 %v2629_v44 }
 0x6a1   : > { %2528 = vmatprep.subr.bf16.mxu1 %v2808_v8 }
 0x6a4   : > { %2529 = vmatpush3.bf16.msra.mxu1 %v2630_v45 }
 0x747   : > { %v1983_v16 = vpop.f32.mrf.mxu1 }
 0x748   : > { %v1984_v6 = vadd.f32 %v2363_v15, %v1983_v16 }
 0x749   : > { %v2504_v7 = vpop.f32.mrf.mxu1 }
 0x74a   : > { %v3276_v17 = vadd.f32 %v1984_v6, %v3054_v0 }
 0x74b   : > { %v1986_v18 = vpop.f32.mrf.mxu1 }
 0x74c   : > { %v1992_v19 = vsel %vm663_vm0, %v3276_v17, 0.0 }
 0x74d   : > { %1993 = vadd.xlane.f32.xlu1 %v1992_v19  ;;  %v2505_v20 = vpop.f32.mrf.mxu1 }
 0x7d6   : > { %v1994_v21 = vpop.xlane.xlu1 %1993 }
 0x7d7   : > { %v1995_v22 = vmul.f32 0.03125, %v1994_v21 }
 0x7d9   : > { %v1996_v23 = vsub.f32 %v3276_v17, %v1995_v22 }
 0x7db   : > { %v1997_v24 = vmul.f32 %v1996_v23, %v1996_v23 }
 0x7dd   : > { %v1998_v25 = vsel %vm663_vm0, %v1997_v24, 0.0 }
 0x7de   : > { %1999 = vadd.xlane.f32.xlu0 %v1998_v25 }
 0x867   : > { %v2000_v0 = vpop.xlane.xlu0 %1999 }
 0x868   : > { %v2001_v28 = vmul.f32 0.03125, %v2000_v0 }
 0x86a   : > { %v2002_v29 = vadd.f32 1e-05, %v2001_v28 }
 0x86c   : > { %2649 = vrsqrt.f32 %v2002_v29 }
 0x879   : > { %v2650_v30 = vpop.eup %2649 }
 0x87a   : > { %v2004_v32 = vmul.f32 %v2650_v30, %v1996_v23 }
 0x87c   : > { %v2011_v34 = vmul.f32 %v2367_v31, %v2004_v32 }
 0x87e   : > { %v2018_v36 = vadd.f32 %v2368_v33, %v2011_v34 }
 0x880   : > { %v2019_v37 = vpack.c.bf16 %v2018_v36, %v2018_v36 }
 0x882   : > { %2511 = vmatmul.mubr.msk.bf16.vlgmr.msra.gmra.mxu0 %vm663_vm0, %v2019_v37 }
 0x942   : > { %v2080_v47 = vpop.f32.mrf.mxu0 }
 0x943   : > { %v2081_v48 = vadd.f32 %v2369_v46, %v2080_v47 }
 0x944   : > { %v2512_v49 = vpop.f32.mrf.mxu0 }
 0x945   : > { %v2086_v51 = vmul.f32 %v2081_v48, %v2081_v48 }
 0x946   : > { %v2083_v52 = vpop.f32.mrf.mxu0 }
 0x947   : > { %v2087_v53 = vmul.f32 %v2086_v51, %v2081_v48 }
 0x948   : > { %v2513_v54 = vpop.f32.mrf.mxu0 }
 0x949   : > { %v2088_v55 = vmul.f32 0.044715, %v2087_v53 }
 0x94b   : > { %v2089_v57 = vadd.f32 %v2088_v55, %v2081_v48 }
 0x94d   : > { %v2090_v58 = vmul.f32 0.7978846, %v2089_v57 }
 0x94f   : > { %2651 = vtanh.f32 %v2090_v58 }
 0x95c   : > { %v2652_v59 = vpop.eup %2651 }
 0x95d   : > { %v2092_v8 = vadd.f32 1.0, %v2652_v59 }
 0x95f   : > { %v2093_v62 = vmul.f32 0.5, %v2092_v8 }
 0x961   : > { %v2094_v35 = vmul.f32 %v2093_v62, %v2081_v48 }
 0x963   : > { %v2095_v63 = vpack.c.bf16 %v2094_v35, %v2094_v35 }
 0x965   : > { %2531 = vmatmul.mubr.bf16.vlgmr.msra.gmra.mxu1 %v2095_v63 }
 0xa25   : > { %v2201_v2 = vpop.f32.mrf.mxu1 }
 0xa26   : > { %v2202_v3 = vadd.f32 %v2373_v1, %v2201_v2 }
 0xa27   : > { %v2532_v4 = vpop.f32.mrf.mxu1 }
 0xa28   : > { %v2207_v60 = vadd.f32 %v2202_v3, %v3276_v17 }
 0xa29   : > { %v2204_v61 = vpop.f32.mrf.mxu1 }
 0xa2a   : > { %2208 = vst.msk [vmem:[%s654_s23] sm:$0xff] %vm663_vm0, %v2207_v60 }
 0xa2b   : > { %v2533_v5 = vpop.f32.mrf.mxu1 }
 0xa2c   : > { %2746 = shalt.err (!%p2743_p3)
}
 0xa2d   : > { %s2747_s2 = scalar_lea.hbm %s3333_s27, 128  ;;  %s2751_s26 = scalar_lea.hbm %s3445_s19, 256 }
 0xa2e   : > { %p2748_p7 = scmp.ne.s32.totalorder %s3333_s27, %s2747_s2  ;;  %p2752_p8 = scmp.lt.s32.totalorder %s3333_s27, %s3445_s19 }
 0xa2f   : > { %p2753_p11 = scmp.lt.s32.totalorder %s2751_s26, %s2747_s2 }
 0xa30   : > { %p2749_p10 = pnand %p2748_p7, %p3446_p1 }
 0xa31   : > { %p2754_p13 = por %p2753_p11, %p2752_p8 }
 0xa32   : > { %p2750_p5 = pneg %p2749_p10 }
 0xa34   : > { %p2755_p0 = pnand %p2754_p13, %p2750_p5 }
 0xa36   : > { %2758 = shalt.err (!%p2755_p0)
}
 0xa37   : > { %2544 = dma.vmem_to_hbm [thread:$0]  (%p3446_p1), %s3335_s28, 128, %s3333_s27, %s2210_s1  }
 0xa38 PF: > { %s3447_s20 = sld [smem:[#allocation12_spill]] }
 0xa39   : > { %s3448_s16 = sld [smem:[#allocation15_spill]] }
 0xa3a   : > { %s3449_s21 = sld [smem:[#allocation14_spill]] }
 0xa3e   : > { %s2235_s24 = sand.u32 1, %s3447_s20  }
 0xa3f   : > { %p3450_p2 = scmp.ne.s32.totalorder %s3448_s16, 0  ;;  %s2236_s25 = scalar_lea.sflag [#allocation4], %s2235_s24 }
 0xa40   : > { %p3451_p4 = scmp.ge.s32.totalorder %s3449_s21, 2 }
 0xa42   : > { %p2558_p6 = pnand %p3451_p4, %p3450_p2 }
 0xa44   : > { %p2559_p9 = pneg %p2558_p6 }
 0xa46   : > { %2784 = dma.done.wait (%p2559_p9), %s2236_s25, 128  }
 0xa47   : > { %2786 = vsyncadd (%p2559_p9), %s2236_s25, 4294967168  ;;  %s3452_s21 = sld [smem:[#allocation16_spill]]  ;;  %s3455_s0 = smov %s2793_s30 }
 0xa48   : > { %s3453_s29 = sld [smem:[#allocation13_spill]] }
 0xa49   : > { %s3454_s20 = sld [smem:[#allocation18_spill]] }
 0xa4d   : > { %p33_p12 = scmp.ge.s32.totalorder %s3452_s21, 4  }
 0xa4e   : > { %s3456_s30 = smov %s3453_s29 }
 0xa4f   :  { %35 = sbr.rel (!%p33_p12) target bundleno = 15 (0xf), region = 152 }
 0xa54   :  { %2241 = vsyncpa [#allocation3], 1 }
 0xa55   :  { %2243 = vsyncpa [#allocation3 + $0x1], 1 }
 0xa56   :  { %2244 = vsyncpa [#allocation6], 1 }
 0xa57   :  { %2245 = vsyncpa [#allocation4], 1 }
 0xa58   :  { %2247 = vsyncpa [#allocation4 + $0x1], 1 }

</bundles_post_ra>
